<compile_context>
chip_gen: v7x
topology: tpu7x:2x2x1
jax: 0.10.0
libtpu: 0.0.40
codegen_flags: <defaults>
</compile_context>

<pallas_src>
from functools import partial

import jax
import jax.numpy as jnp
from jax.experimental import pallas as pl
from jax.experimental.pallas import tpu as pltpu


# ----------------------------- Pallas kernel --------------------------------
def encoder_kernel(prompt_ref, frames_ref, mask_ref, pos_ref,
                   wproj_ref, bproj_ref,
                   ln1g_ref, ln1b_ref,
                   wqkv_ref, bqkv_ref,
                   wo_ref, bo_ref,
                   ln2g_ref, ln2b_ref,
                   w1_ref, b1_ref, w2_ref, b2_ref,
                   out_ref, x_scr, *, num_heads):
    f32 = jnp.float32
    bf16 = jnp.bfloat16

    prompt = prompt_ref[0]                 # (Tp, D) bf16 prompt embeddings
    frames = frames_ref[0]                 # (Tf, F) bf16 flattened frame feats
    mask = mask_ref[0]                     # (1, S)  f32 additive key mask
    pos = pos_ref[...]                     # (S, D)  f32 positional embeddings

    Tp = prompt.shape[0]
    S, D = x_scr.shape
    H = num_heads
    hd = D // H

    # --- frame feature projection (Linear F -> D): bf16 MXU, f32 accumulate --
    x_frames = jnp.dot(frames, wproj_ref[...],
                       preferred_element_type=f32) + bproj_ref[...]

    # Assemble residual stream into 8-aligned row ranges of VMEM scratch
    # (no sublane-axis concatenate).
    x_scr[0:Tp, :] = prompt.astype(f32) + pos[0:Tp, :]
    x_scr[Tp:S, :] = x_frames + pos[Tp:S, :]
    x = x_scr[...]                         # (S, D) f32 residual stream

    def layer_norm(v, g, b):
        mu = jnp.mean(v, axis=-1, keepdims=True)
        var = jnp.mean(jnp.square(v - mu), axis=-1, keepdims=True)
        return (v - mu) * jax.lax.rsqrt(var + 1e-5) * g + b

    # --- self-attention block (pre-LN) ---------------------------------------
    xn = layer_norm(x, ln1g_ref[...], ln1b_ref[...]).astype(bf16)

    # Fused QKV: one lane-dense (S,D)@(D,3D) MXU matmul.  The 1/sqrt(hd) scale
    # is pre-folded into the Q columns of w_qkv / b_qkv at init.
    qkv = jnp.dot(xn, wqkv_ref[...],
                  preferred_element_type=f32) + bqkv_ref[...]      # (S, 3D)

    # Heads are split only for the scores / context matmuls (static lane
    # slices, 2-D dots only -> robust Mosaic lowering).
    # TODO(synk): for larger H / S replace this short unrolled loop with a
    # KV-block-tiled flash-attention lax.fori_loop (online softmax).
    ctx_heads = []
    for h in range(H):
        q_h = qkv[:, h * hd:(h + 1) * hd].astype(bf16)             # (S, hd)
        k_h = qkv[:, D + h * hd:D + (h + 1) * hd].astype(bf16)     # (S, hd)
        v_h = qkv[:, 2 * D + h * hd:2 * D + (h + 1) * hd].astype(bf16)

        # scores = q_h @ k_h^T without an explicit transpose.
        s_h = jax.lax.dot_general(q_h, k_h, (((1,), (1,)), ((), ())),
                                  preferred_element_type=f32)      # (S, S)
        s_h = s_h + mask                                           # key mask
        m_h = jnp.max(s_h, axis=-1, keepdims=True)
        p_h = jnp.exp(s_h - m_h)
        denom = jnp.maximum(jnp.sum(p_h, axis=-1, keepdims=True), 1e-20)

        # Deferred normalization: normalize the (S, hd) context instead of the
        # (S, S) probabilities; reciprocal on the EUP slot.
        ctx_h = jnp.dot(p_h.astype(bf16), v_h,
                        preferred_element_type=f32)                # (S, hd)
        ctx_h = ctx_h * pl.reciprocal(denom, approx=True)
        ctx_heads.append(ctx_h.astype(bf16))

    ctx = jnp.concatenate(ctx_heads, axis=-1)                      # (S, D) bf16

    # Single output projection: head reduction folded into MXU K dim.
    attn_out = jnp.dot(ctx, wo_ref[...],
                       preferred_element_type=f32) + bo_ref[...]   # (S, D)
    x = x + attn_out

    # --- feed-forward block (pre-LN) ------------------------------------------
    xn2 = layer_norm(x, ln2g_ref[...], ln2b_ref[...]).astype(bf16)
    h1 = jnp.dot(xn2, w1_ref[...], preferred_element_type=f32) + b1_ref[...]
    h1 = jax.nn.gelu(h1)
    h2 = jnp.dot(h1.astype(bf16), w2_ref[...],
                 preferred_element_type=f32) + b2_ref[...]
    x = x + h2

    out_ref[0] = x.astype(out_ref.dtype)


# ------------------------------- wrapper -------------------------------------
def encoder_forward(prompt_emb, frame_feats, mask_add, pos_emb, params,
                    *, num_heads):
    """prompt_emb: (B, Tp, D) bf16    frame_feats: (B, Tf, F) bf16
       mask_add:   (B, 1, S)  f32 additive    pos_emb: (S, D) f32"""
    B, Tp, D = prompt_emb.shape
    _, Tf, F = frame_feats.shape
    S = Tp + Tf
    assert D % num_heads == 0 and D % 128 == 0 and S % 8 == 0 and Tp % 8 == 0
    ffn_dim = params["w_1"].shape[1]

    def batched(shape):      # per-batch block (whole slab each grid step)
        nd = len(shape)
        return pl.BlockSpec((1,) + shape, lambda b: (b,) + (0,) * nd)

    def shared(shape):       # weights: constant index_map across the grid
        nd = len(shape)
        return pl.BlockSpec(shape, lambda b: (0,) * nd)

    in_specs = [
        batched((Tp, D)),            # prompt embeddings
        batched((Tf, F)),            # frame features
        batched((1, S)),             # additive key mask
        shared((S, D)),              # positional embeddings
        shared(params["w_proj"].shape), shared(params["b_proj"].shape),
        shared(params["ln1_g"].shape), shared(params["ln1_b"].shape),
        shared(params["w_qkv"].shape), shared(params["b_qkv"].shape),
        shared(params["w_o"].shape), shared(params["b_o"].shape),
        shared(params["ln2_g"].shape), shared(params["ln2_b"].shape),
        shared(params["w_1"].shape), shared(params["b_1"].shape),
        shared(params["w_2"].shape), shared(params["b_2"].shape),
    ]
    out_spec = pl.BlockSpec((1, S, D), lambda b: (b, 0, 0))

    args = (prompt_emb, frame_feats, mask_add, pos_emb,
            params["w_proj"], params["b_proj"],
            params["ln1_g"], params["ln1_b"],
            params["w_qkv"], params["b_qkv"],
            params["w_o"], params["b_o"],
            params["ln2_g"], params["ln2_b"],
            params["w_1"], params["b_1"],
            params["w_2"], params["b_2"])

    # Advisory cost estimate so XLA schedules surrounding glue (embedding
    # gather, mask build) around the kernel instead of serializing.
    flops = B * (2 * Tf * F * D
                 + 2 * S * D * (3 * D)        # fused QKV projection
                 + 2 * 2 * S * S * D          # scores + context (all heads)
                 + 2 * S * D * D              # output projection
                 + 2 * 2 * S * D * ffn_dim)   # FFN
    transcendentals = B * (num_heads * S * S + S * ffn_dim)
    bytes_accessed = (sum(int(a.size) * a.dtype.itemsize for a in args)
                      + B * S * D * 2)        # bf16 output

    fn = pl.pallas_call(
        partial(encoder_kernel, num_heads=num_heads),
        out_shape=jax.ShapeDtypeStruct((B, S, D), jnp.bfloat16),
        grid_spec=pltpu.PrefetchScalarGridSpec(
            num_scalar_prefetch=0,
            grid=(B,),                        # B>=4 -> >=2 steps per v7x core
            in_specs=in_specs,
            out_specs=out_spec,
            scratch_shapes=[pltpu.VMEM((S, D), jnp.float32)],
        ),
        compiler_params=pltpu.CompilerParams(
            dimension_semantics=("parallel",),
        ),
        cost_estimate=pl.CostEstimate(
            flops=int(flops),
            transcendentals=int(transcendentals),
            bytes_accessed=int(bytes_accessed)),
    )
    return fn(*args)


# ----------------------------- parameter setup --------------------------------
def init_params(key, *, frame_dim, hidden, ffn, heads, vocab, max_len):
    hd = hidden // heads
    scale = 1.0 / (hd ** 0.5)
    ks = jax.random.split(key, 9)
    s = 0.02
    f32, bf16 = jnp.float32, jnp.bfloat16

    def w(k, shape):
        return jax.random.normal(k, shape, f32) * s

    # Fused QKV weight (D, 3D); the attention scale is folded into the Q slice.
    w_q = w(ks[3], (hidden, hidden)) * scale
    w_k = w(ks[4], (hidden, hidden))
    w_v = w(ks[5], (hidden, hidden))
    w_qkv = jnp.concatenate([w_q, w_k, w_v], axis=1).astype(bf16)
    b_qkv = jnp.zeros((1, 3 * hidden), f32)   # (scaled Q bias is zero anyway)

    return {
        "embed":  w(ks[0], (vocab, hidden)).astype(bf16),
        "pos":    w(ks[1], (max_len, hidden)),
        "w_proj": w(ks[2], (frame_dim, hidden)).astype(bf16),
        "b_proj": jnp.zeros((1, hidden), f32),
        "ln1_g":  jnp.ones((1, hidden), f32),
        "ln1_b":  jnp.zeros((1, hidden), f32),
        "w_qkv":  w_qkv, "b_qkv": b_qkv,
        "w_o":    w(ks[6], (hidden, hidden)).astype(bf16),
        "b_o":    jnp.zeros((1, hidden), f32),
        "ln2_g":  jnp.ones((1, hidden), f32),
        "ln2_b":  jnp.zeros((1, hidden), f32),
        "w_1": w(ks[7], (hidden, ffn)).astype(bf16), "b_1": jnp.zeros((1, ffn), f32),
        "w_2": w(ks[8], (ffn, hidden)).astype(bf16), "b_2": jnp.zeros((1, hidden), f32),
    }


# --------------------------------- main ---------------------------------------
if __name__ == "__main__":
    # Small but lane/sublane-aligned shapes; B=4 gives each v7x core 2 steps.
    B, Tp, Tf = 4, 8, 8              # batch, prompt length, number of frames
    C, Hf, Wf = 2, 8, 8              # per-frame NCHW -> F = C*Hf*Wf = 128
    F = C * Hf * Wf
    D, HEADS, FFN = 128, 4, 256
    VOCAB = 64
    S = Tp + Tf

    key = jax.random.PRNGKey(0)
    k_in, k_prm, k_tok = jax.random.split(key, 3)

    params = init_params(k_prm, frame_dim=F, hidden=D, ffn=FFN, heads=HEADS,
                         vocab=VOCAB, max_len=S)

    # input_frames: (B, Tf, C, Hf, Wf) -- NCHW per time-step, flattened to feats
    input_frames = jax.random.normal(k_in, (B, Tf, C, Hf, Wf), jnp.float32)
    frame_feats = input_frames.reshape(B, Tf, F).astype(jnp.bfloat16)

    # src_prompt token ids + embedding lookup (glue, not hot path)
    src_prompt = jax.random.randint(k_tok, (B, Tp), 0, VOCAB)
    prompt_emb = params["embed"][src_prompt]                    # (B, Tp, D) bf16

    # padding masks: 1 = keep, 0 = pad
    source_prompt_length_padding_mask = jnp.ones((B, Tp), jnp.float32)
    attention_mask = jnp.ones((B, Tf), jnp.float32).at[1, -1].set(0.0)
    full_mask = jnp.concatenate(
        [source_prompt_length_padding_mask, attention_mask], axis=1)  # (B, S)
    mask_add = ((1.0 - full_mask) * -1e9)[:, None, :]                 # (B, 1, S)

    out = encoder_forward(prompt_emb, frame_feats, mask_add, params["pos"],
                          params, num_heads=HEADS)
    out = jax.block_until_ready(out)

    assert out.shape == (B, S, D)
    assert bool(jnp.all(jnp.isfinite(out.astype(jnp.float32))))
    print("KERNEL_OK")
</pallas_src>

<mosaic_0001>
module attributes {stable_mosaic.version = 11 : i64} {
  func.func @encoder_kernel(%arg0: i32, %arg1: memref<1x8x128xbf16, #tpu.memory_space<vmem>>, %arg2: memref<1x8x128xbf16, #tpu.memory_space<vmem>>, %arg3: memref<1x1x16xf32, #tpu.memory_space<vmem>>, %arg4: memref<16x128xf32, #tpu.memory_space<vmem>>, %arg5: memref<128x128xbf16, #tpu.memory_space<vmem>>, %arg6: memref<1x128xf32, #tpu.memory_space<vmem>>, %arg7: memref<1x128xf32, #tpu.memory_space<vmem>>, %arg8: memref<1x128xf32, #tpu.memory_space<vmem>>, %arg9: memref<128x384xbf16, #tpu.memory_space<vmem>>, %arg10: memref<1x384xf32, #tpu.memory_space<vmem>>, %arg11: memref<128x128xbf16, #tpu.memory_space<vmem>>, %arg12: memref<1x128xf32, #tpu.memory_space<vmem>>, %arg13: memref<1x128xf32, #tpu.memory_space<vmem>>, %arg14: memref<1x128xf32, #tpu.memory_space<vmem>>, %arg15: memref<128x256xbf16, #tpu.memory_space<vmem>>, %arg16: memref<1x256xf32, #tpu.memory_space<vmem>>, %arg17: memref<256x128xbf16, #tpu.memory_space<vmem>>, %arg18: memref<1x128xf32, #tpu.memory_space<vmem>>, %arg19: memref<1x16x128xbf16, #tpu.memory_space<vmem>>, %arg20: memref<16x128xf32, #tpu.memory_space<vmem>>) attributes {dimension_semantics = [#tpu.dimension_semantics<parallel>], iteration_bounds = array<i64: 4>, scalar_prefetch = 0 : i64, scratch_operands = 1 : i64, tpu.core_type = #tpu.core_type<tc>, window_params = [{transform_indices = @transform_0, window_bounds = array<i64: 1, 8, 128>}, {transform_indices = @transform_1, window_bounds = array<i64: 1, 8, 128>}, {transform_indices = @transform_2, window_bounds = array<i64: 1, 1, 16>}, {pipeline_mode = #tpu.pipeline_mode<synchronous>, transform_indices = @transform_3, window_bounds = array<i64: 16, 128>}, {pipeline_mode = #tpu.pipeline_mode<synchronous>, transform_indices = @transform_4, window_bounds = array<i64: 128, 128>}, {pipeline_mode = #tpu.pipeline_mode<synchronous>, transform_indices = @transform_5, window_bounds = array<i64: 1, 128>}, {pipeline_mode = #tpu.pipeline_mode<synchronous>, transform_indices = @transform_6, window_bounds = array<i64: 1, 128>}, {pipeline_mode = #tpu.pipeline_mode<synchronous>, transform_indices = @transform_7, window_bounds = array<i64: 1, 128>}, {pipeline_mode = #tpu.pipeline_mode<synchronous>, transform_indices = @transform_8, window_bounds = array<i64: 128, 384>}, {pipeline_mode = #tpu.pipeline_mode<synchronous>, transform_indices = @transform_9, window_bounds = array<i64: 1, 384>}, {pipeline_mode = #tpu.pipeline_mode<synchronous>, transform_indices = @transform_10, window_bounds = array<i64: 128, 128>}, {pipeline_mode = #tpu.pipeline_mode<synchronous>, transform_indices = @transform_11, window_bounds = array<i64: 1, 128>}, {pipeline_mode = #tpu.pipeline_mode<synchronous>, transform_indices = @transform_12, window_bounds = array<i64: 1, 128>}, {pipeline_mode = #tpu.pipeline_mode<synchronous>, transform_indices = @transform_13, window_bounds = array<i64: 1, 128>}, {pipeline_mode = #tpu.pipeline_mode<synchronous>, transform_indices = @transform_14, window_bounds = array<i64: 128, 256>}, {pipeline_mode = #tpu.pipeline_mode<synchronous>, transform_indices = @transform_15, window_bounds = array<i64: 1, 256>}, {pipeline_mode = #tpu.pipeline_mode<synchronous>, transform_indices = @transform_16, window_bounds = array<i64: 256, 128>}, {pipeline_mode = #tpu.pipeline_mode<synchronous>, transform_indices = @transform_17, window_bounds = array<i64: 1, 128>}, {transform_indices = @transform_18, window_bounds = array<i64: 1, 16, 128>}]} {
    %c0 = arith.constant 0 : index
    %c0_0 = arith.constant 0 : index
    %c0_1 = arith.constant 0 : index
    %0 = vector.load %arg1[%c0, %c0_0, %c0_1] : memref<1x8x128xbf16, #tpu.memory_space<vmem>>, vector<1x8x128xbf16>
    %1 = vector.shape_cast %0 : vector<1x8x128xbf16> to vector<8x128xbf16>
    %c0_2 = arith.constant 0 : index
    %c0_3 = arith.constant 0 : index
    %c0_4 = arith.constant 0 : index
    %2 = vector.load %arg2[%c0_2, %c0_3, %c0_4] : memref<1x8x128xbf16, #tpu.memory_space<vmem>>, vector<1x8x128xbf16>
    %3 = vector.shape_cast %2 : vector<1x8x128xbf16> to vector<8x128xbf16>
    %c0_5 = arith.constant 0 : index
    %c0_6 = arith.constant 0 : index
    %c0_7 = arith.constant 0 : index
    %4 = vector.load %arg3[%c0_5, %c0_6, %c0_7] : memref<1x1x16xf32, #tpu.memory_space<vmem>>, vector<1x1x16xf32>
    %5 = vector.shape_cast %4 : vector<1x1x16xf32> to vector<1x16xf32>
    %c0_8 = arith.constant 0 : index
    %c0_9 = arith.constant 0 : index
    %6 = vector.load %arg4[%c0_8, %c0_9] : memref<16x128xf32, #tpu.memory_space<vmem>>, vector<16x128xf32>
    %c0_10 = arith.constant 0 : index
    %c0_11 = arith.constant 0 : index
    %7 = vector.load %arg5[%c0_10, %c0_11] : memref<128x128xbf16, #tpu.memory_space<vmem>>, vector<128x128xbf16>
    %cst = arith.constant dense<0.000000e+00> : vector<8x128xf32>
    %8 = tpu.matmul %3, %7, %cst {dimension_numbers = #tpu.dot_dimension_numbers<[1], [0], [0], [1], [0, 0, 1, 1], [], []>} : vector<8x128xbf16>, vector<128x128xbf16>, vector<8x128xf32> -> vector<8x128xf32>
    %c0_12 = arith.constant 0 : index
    %c0_13 = arith.constant 0 : index
    %9 = vector.load %arg6[%c0_12, %c0_13] : memref<1x128xf32, #tpu.memory_space<vmem>>, vector<1x128xf32>
    %10 = vector.broadcast %9 : vector<1x128xf32> to vector<8x128xf32>
    %11 = arith.addf %8, %10 : vector<8x128xf32>
    %12 = arith.extf %1 : vector<8x128xbf16> to vector<8x128xf32>
    %13 = vector.extract_strided_slice %6 {offsets = [0, 0], sizes = [8, 128], strides = [1, 1]} : vector<16x128xf32> to vector<8x128xf32>
    %14 = arith.addf %12, %13 : vector<8x128xf32>
    %c0_14 = arith.constant 0 : index
    %c0_15 = arith.constant 0 : index
    %15 = vector.load %arg20[%c0_14, %c0_15] : memref<16x128xf32, #tpu.memory_space<vmem>>, vector<8x128xf32>
    tpu.vector_store %arg20[%c0_14, %c0_15], %14 {strides = array<i32>} : memref<16x128xf32, #tpu.memory_space<vmem>>, vector<8x128xf32>,
    %16 = vector.extract_strided_slice %6 {offsets = [8, 0], sizes = [8, 128], strides = [1, 1]} : vector<16x128xf32> to vector<8x128xf32>
    %17 = arith.addf %11, %16 : vector<8x128xf32>
    %c8 = arith.constant 8 : index
    %c0_16 = arith.constant 0 : index
    %18 = vector.load %arg20[%c8, %c0_16] : memref<16x128xf32, #tpu.memory_space<vmem>>, vector<8x128xf32>
    tpu.vector_store %arg20[%c8, %c0_16], %17 {strides = array<i32>} : memref<16x128xf32, #tpu.memory_space<vmem>>, vector<8x128xf32>,
    %c0_17 = arith.constant 0 : index
    %c0_18 = arith.constant 0 : index
    %19 = vector.load %arg20[%c0_17, %c0_18] : memref<16x128xf32, #tpu.memory_space<vmem>>, vector<16x128xf32>
    %c0_19 = arith.constant 0 : index
    %c0_20 = arith.constant 0 : index
    %20 = vector.load %arg7[%c0_19, %c0_20] : memref<1x128xf32, #tpu.memory_space<vmem>>, vector<1x128xf32>
    %c0_21 = arith.constant 0 : index
    %c0_22 = arith.constant 0 : index
    %21 = vector.load %arg8[%c0_21, %c0_22] : memref<1x128xf32, #tpu.memory_space<vmem>>, vector<1x128xf32>
    %cst_23 = arith.constant dense<0.000000e+00> : vector<16xf32>
    %22 = vector.multi_reduction <add>, %19, %cst_23 [1] : vector<16x128xf32> to vector<16xf32>
    %23 = vector.shape_cast %22 : vector<16xf32> to vector<16x1xf32>
    %cst_24 = arith.constant 1.280000e+02 : f32
    %24 = vector.broadcast %cst_24 : f32 to vector<16x1xf32>
    %25 = arith.divf %23, %24 : vector<16x1xf32>
    %26 = vector.broadcast %25 : vector<16x1xf32> to vector<16x128xf32>
    %27 = arith.subf %19, %26 : vector<16x128xf32>
    %28 = arith.mulf %27, %27 : vector<16x128xf32>
    %cst_25 = arith.constant dense<0.000000e+00> : vector<16xf32>
    %29 = vector.multi_reduction <add>, %28, %cst_25 [1] : vector<16x128xf32> to vector<16xf32>
    %30 = vector.shape_cast %29 : vector<16xf32> to vector<16x1xf32>
    %cst_26 = arith.constant 1.280000e+02 : f32
    %31 = vector.broadcast %cst_26 : f32 to vector<16x1xf32>
    %32 = arith.divf %30, %31 : vector<16x1xf32>
    %33 = vector.broadcast %25 : vector<16x1xf32> to vector<16x128xf32>
    %34 = arith.subf %19, %33 : vector<16x128xf32>
    %cst_27 = arith.constant 9.99999974E-6 : f32
    %35 = vector.broadcast %cst_27 : f32 to vector<16x1xf32>
    %36 = arith.addf %32, %35 : vector<16x1xf32>
    %37 = math.rsqrt %36 : vector<16x1xf32>
    %38 = vector.broadcast %37 : vector<16x1xf32> to vector<16x128xf32>
    %39 = arith.mulf %34, %38 : vector<16x128xf32>
    %40 = vector.broadcast %20 : vector<1x128xf32> to vector<16x128xf32>
    %41 = arith.mulf %39, %40 : vector<16x128xf32>
    %42 = vector.broadcast %21 : vector<1x128xf32> to vector<16x128xf32>
    %43 = arith.addf %41, %42 : vector<16x128xf32>
    %44 = arith.truncf %43 : vector<16x128xf32> to vector<16x128xbf16>
    %c0_28 = arith.constant 0 : index
    %c0_29 = arith.constant 0 : index
    %45 = vector.load %arg9[%c0_28, %c0_29] : memref<128x384xbf16, #tpu.memory_space<vmem>>, vector<128x384xbf16>
    %cst_30 = arith.constant dense<0.000000e+00> : vector<16x384xf32>
    %46 = tpu.matmul %44, %45, %cst_30 {dimension_numbers = #tpu.dot_dimension_numbers<[1], [0], [0], [1], [0, 0, 1, 1], [], []>} : vector<16x128xbf16>, vector<128x384xbf16>, vector<16x384xf32> -> vector<16x384xf32>
    %c0_31 = arith.constant 0 : index
    %c0_32 = arith.constant 0 : index
    %47 = vector.load %arg10[%c0_31, %c0_32] : memref<1x384xf32, #tpu.memory_space<vmem>>, vector<1x384xf32>
    %48 = vector.broadcast %47 : vector<1x384xf32> to vector<16x384xf32>
    %49 = arith.addf %46, %48 : vector<16x384xf32>
    %50 = vector.extract_strided_slice %49 {offsets = [0, 0], sizes = [16, 32], strides = [1, 1]} : vector<16x384xf32> to vector<16x32xf32>
    %51 = arith.truncf %50 : vector<16x32xf32> to vector<16x32xbf16>
    %52 = vector.extract_strided_slice %49 {offsets = [0, 128], sizes = [16, 32], strides = [1, 1]} : vector<16x384xf32> to vector<16x32xf32>
    %53 = arith.truncf %52 : vector<16x32xf32> to vector<16x32xbf16>
    %54 = vector.extract_strided_slice %49 {offsets = [0, 256], sizes = [16, 32], strides = [1, 1]} : vector<16x384xf32> to vector<16x32xf32>
    %55 = arith.truncf %54 : vector<16x32xf32> to vector<16x32xbf16>
    %cst_33 = arith.constant dense<0.000000e+00> : vector<16x16xf32>
    %56 = tpu.matmul %51, %53, %cst_33 {dimension_numbers = #tpu.dot_dimension_numbers<[1], [1], [0], [0], [0, 0, 1, 0], [], []>} : vector<16x32xbf16>, vector<16x32xbf16>, vector<16x16xf32> -> vector<16x16xf32>
    %57 = vector.broadcast %5 : vector<1x16xf32> to vector<16x16xf32>
    %58 = arith.addf %56, %57 : vector<16x16xf32>
    %cst_34 = arith.constant dense<0xFF800000> : vector<16xf32>
    %59 = vector.multi_reduction <maximumf>, %58, %cst_34 [1] : vector<16x16xf32> to vector<16xf32>
    %60 = vector.shape_cast %59 : vector<16xf32> to vector<16x1xf32>
    %61 = vector.broadcast %60 : vector<16x1xf32> to vector<16x16xf32>
    %62 = arith.subf %58, %61 : vector<16x16xf32>
    %63 = math.exp %62 : vector<16x16xf32>
    %cst_35 = arith.constant dense<0.000000e+00> : vector<16xf32>
    %64 = vector.multi_reduction <add>, %63, %cst_35 [1] : vector<16x16xf32> to vector<16xf32>
    %65 = vector.shape_cast %64 : vector<16xf32> to vector<16x1xf32>
    %cst_36 = arith.constant 9.99999968E-21 : f32
    %66 = vector.broadcast %cst_36 : f32 to vector<16x1xf32>
    %67 = arith.maximumf %65, %66 : vector<16x1xf32>
    %68 = arith.truncf %63 : vector<16x16xf32> to vector<16x16xbf16>
    %cst_37 = arith.constant dense<0.000000e+00> : vector<16x32xf32>
    %69 = tpu.matmul %68, %55, %cst_37 {dimension_numbers = #tpu.dot_dimension_numbers<[1], [0], [0], [1], [0, 0, 1, 1], [], []>} : vector<16x16xbf16>, vector<16x32xbf16>, vector<16x32xf32> -> vector<16x32xf32>
    %70 = tpu.reciprocal %67 {approx = true} : vector<16x1xf32> -> vector<16x1xf32>
    %71 = vector.broadcast %70 : vector<16x1xf32> to vector<16x32xf32>
    %72 = arith.mulf %69, %71 : vector<16x32xf32>
    %73 = arith.truncf %72 : vector<16x32xf32> to vector<16x32xbf16>
    %74 = vector.extract_strided_slice %49 {offsets = [0, 32], sizes = [16, 32], strides = [1, 1]} : vector<16x384xf32> to vector<16x32xf32>
    %75 = arith.truncf %74 : vector<16x32xf32> to vector<16x32xbf16>
    %76 = vector.extract_strided_slice %49 {offsets = [0, 160], sizes = [16, 32], strides = [1, 1]} : vector<16x384xf32> to vector<16x32xf32>
    %77 = arith.truncf %76 : vector<16x32xf32> to vector<16x32xbf16>
    %78 = vector.extract_strided_slice %49 {offsets = [0, 288], sizes = [16, 32], strides = [1, 1]} : vector<16x384xf32> to vector<16x32xf32>
    %79 = arith.truncf %78 : vector<16x32xf32> to vector<16x32xbf16>
    %cst_38 = arith.constant dense<0.000000e+00> : vector<16x16xf32>
    %80 = tpu.matmul %75, %77, %cst_38 {dimension_numbers = #tpu.dot_dimension_numbers<[1], [1], [0], [0], [0, 0, 1, 0], [], []>} : vector<16x32xbf16>, vector<16x32xbf16>, vector<16x16xf32> -> vector<16x16xf32>
    %81 = vector.broadcast %5 : vector<1x16xf32> to vector<16x16xf32>
    %82 = arith.addf %80, %81 : vector<16x16xf32>
    %cst_39 = arith.constant dense<0xFF800000> : vector<16xf32>
    %83 = vector.multi_reduction <maximumf>, %82, %cst_39 [1] : vector<16x16xf32> to vector<16xf32>
    %84 = vector.shape_cast %83 : vector<16xf32> to vector<16x1xf32>
    %85 = vector.broadcast %84 : vector<16x1xf32> to vector<16x16xf32>
    %86 = arith.subf %82, %85 : vector<16x16xf32>
    %87 = math.exp %86 : vector<16x16xf32>
    %cst_40 = arith.constant dense<0.000000e+00> : vector<16xf32>
    %88 = vector.multi_reduction <add>, %87, %cst_40 [1] : vector<16x16xf32> to vector<16xf32>
    %89 = vector.shape_cast %88 : vector<16xf32> to vector<16x1xf32>
    %cst_41 = arith.constant 9.99999968E-21 : f32
    %90 = vector.broadcast %cst_41 : f32 to vector<16x1xf32>
    %91 = arith.maximumf %89, %90 : vector<16x1xf32>
    %92 = arith.truncf %87 : vector<16x16xf32> to vector<16x16xbf16>
    %cst_42 = arith.constant dense<0.000000e+00> : vector<16x32xf32>
    %93 = tpu.matmul %92, %79, %cst_42 {dimension_numbers = #tpu.dot_dimension_numbers<[1], [0], [0], [1], [0, 0, 1, 1], [], []>} : vector<16x16xbf16>, vector<16x32xbf16>, vector<16x32xf32> -> vector<16x32xf32>
    %94 = tpu.reciprocal %91 {approx = true} : vector<16x1xf32> -> vector<16x1xf32>
    %95 = vector.broadcast %94 : vector<16x1xf32> to vector<16x32xf32>
    %96 = arith.mulf %93, %95 : vector<16x32xf32>
    %97 = arith.truncf %96 : vector<16x32xf32> to vector<16x32xbf16>
    %98 = vector.extract_strided_slice %49 {offsets = [0, 64], sizes = [16, 32], strides = [1, 1]} : vector<16x384xf32> to vector<16x32xf32>
    %99 = arith.truncf %98 : vector<16x32xf32> to vector<16x32xbf16>
    %100 = vector.extract_strided_slice %49 {offsets = [0, 192], sizes = [16, 32], strides = [1, 1]} : vector<16x384xf32> to vector<16x32xf32>
    %101 = arith.truncf %100 : vector<16x32xf32> to vector<16x32xbf16>
    %102 = vector.extract_strided_slice %49 {offsets = [0, 320], sizes = [16, 32], strides = [1, 1]} : vector<16x384xf32> to vector<16x32xf32>
    %103 = arith.truncf %102 : vector<16x32xf32> to vector<16x32xbf16>
    %cst_43 = arith.constant dense<0.000000e+00> : vector<16x16xf32>
    %104 = tpu.matmul %99, %101, %cst_43 {dimension_numbers = #tpu.dot_dimension_numbers<[1], [1], [0], [0], [0, 0, 1, 0], [], []>} : vector<16x32xbf16>, vector<16x32xbf16>, vector<16x16xf32> -> vector<16x16xf32>
    %105 = vector.broadcast %5 : vector<1x16xf32> to vector<16x16xf32>
    %106 = arith.addf %104, %105 : vector<16x16xf32>
    %cst_44 = arith.constant dense<0xFF800000> : vector<16xf32>
    %107 = vector.multi_reduction <maximumf>, %106, %cst_44 [1] : vector<16x16xf32> to vector<16xf32>
    %108 = vector.shape_cast %107 : vector<16xf32> to vector<16x1xf32>
    %109 = vector.broadcast %108 : vector<16x1xf32> to vector<16x16xf32>
    %110 = arith.subf %106, %109 : vector<16x16xf32>
    %111 = math.exp %110 : vector<16x16xf32>
    %cst_45 = arith.constant dense<0.000000e+00> : vector<16xf32>
    %112 = vector.multi_reduction <add>, %111, %cst_45 [1] : vector<16x16xf32> to vector<16xf32>
    %113 = vector.shape_cast %112 : vector<16xf32> to vector<16x1xf32>
    %cst_46 = arith.constant 9.99999968E-21 : f32
    %114 = vector.broadcast %cst_46 : f32 to vector<16x1xf32>
    %115 = arith.maximumf %113, %114 : vector<16x1xf32>
    %116 = arith.truncf %111 : vector<16x16xf32> to vector<16x16xbf16>
    %cst_47 = arith.constant dense<0.000000e+00> : vector<16x32xf32>
    %117 = tpu.matmul %116, %103, %cst_47 {dimension_numbers = #tpu.dot_dimension_numbers<[1], [0], [0], [1], [0, 0, 1, 1], [], []>} : vector<16x16xbf16>, vector<16x32xbf16>, vector<16x32xf32> -> vector<16x32xf32>
    %118 = tpu.reciprocal %115 {approx = true} : vector<16x1xf32> -> vector<16x1xf32>
    %119 = vector.broadcast %118 : vector<16x1xf32> to vector<16x32xf32>
    %120 = arith.mulf %117, %119 : vector<16x32xf32>
    %121 = arith.truncf %120 : vector<16x32xf32> to vector<16x32xbf16>
    %122 = vector.extract_strided_slice %49 {offsets = [0, 96], sizes = [16, 32], strides = [1, 1]} : vector<16x384xf32> to vector<16x32xf32>
    %123 = arith.truncf %122 : vector<16x32xf32> to vector<16x32xbf16>
    %124 = vector.extract_strided_slice %49 {offsets = [0, 224], sizes = [16, 32], strides = [1, 1]} : vector<16x384xf32> to vector<16x32xf32>
    %125 = arith.truncf %124 : vector<16x32xf32> to vector<16x32xbf16>
    %126 = vector.extract_strided_slice %49 {offsets = [0, 352], sizes = [16, 32], strides = [1, 1]} : vector<16x384xf32> to vector<16x32xf32>
    %127 = arith.truncf %126 : vector<16x32xf32> to vector<16x32xbf16>
    %cst_48 = arith.constant dense<0.000000e+00> : vector<16x16xf32>
    %128 = tpu.matmul %123, %125, %cst_48 {dimension_numbers = #tpu.dot_dimension_numbers<[1], [1], [0], [0], [0, 0, 1, 0], [], []>} : vector<16x32xbf16>, vector<16x32xbf16>, vector<16x16xf32> -> vector<16x16xf32>
    %129 = vector.broadcast %5 : vector<1x16xf32> to vector<16x16xf32>
    %130 = arith.addf %128, %129 : vector<16x16xf32>
    %cst_49 = arith.constant dense<0xFF800000> : vector<16xf32>
    %131 = vector.multi_reduction <maximumf>, %130, %cst_49 [1] : vector<16x16xf32> to vector<16xf32>
    %132 = vector.shape_cast %131 : vector<16xf32> to vector<16x1xf32>
    %133 = vector.broadcast %132 : vector<16x1xf32> to vector<16x16xf32>
    %134 = arith.subf %130, %133 : vector<16x16xf32>
    %135 = math.exp %134 : vector<16x16xf32>
    %cst_50 = arith.constant dense<0.000000e+00> : vector<16xf32>
    %136 = vector.multi_reduction <add>, %135, %cst_50 [1] : vector<16x16xf32> to vector<16xf32>
    %137 = vector.shape_cast %136 : vector<16xf32> to vector<16x1xf32>
    %cst_51 = arith.constant 9.99999968E-21 : f32
    %138 = vector.broadcast %cst_51 : f32 to vector<16x1xf32>
    %139 = arith.maximumf %137, %138 : vector<16x1xf32>
    %140 = arith.truncf %135 : vector<16x16xf32> to vector<16x16xbf16>
    %cst_52 = arith.constant dense<0.000000e+00> : vector<16x32xf32>
    %141 = tpu.matmul %140, %127, %cst_52 {dimension_numbers = #tpu.dot_dimension_numbers<[1], [0], [0], [1], [0, 0, 1, 1], [], []>} : vector<16x16xbf16>, vector<16x32xbf16>, vector<16x32xf32> -> vector<16x32xf32>
    %142 = tpu.reciprocal %139 {approx = true} : vector<16x1xf32> -> vector<16x1xf32>
    %143 = vector.broadcast %142 : vector<16x1xf32> to vector<16x32xf32>
    %144 = arith.mulf %141, %143 : vector<16x32xf32>
    %145 = arith.truncf %144 : vector<16x32xf32> to vector<16x32xbf16>
    %146 = tpu.concatenate %73, %97, %121, %145 in 1 : vector<16x32xbf16>, vector<16x32xbf16>, vector<16x32xbf16>, vector<16x32xbf16> -> vector<16x128xbf16>
    %c0_53 = arith.constant 0 : index
    %c0_54 = arith.constant 0 : index
    %147 = vector.load %arg11[%c0_53, %c0_54] : memref<128x128xbf16, #tpu.memory_space<vmem>>, vector<128x128xbf16>
    %cst_55 = arith.constant dense<0.000000e+00> : vector<16x128xf32>
    %148 = tpu.matmul %146, %147, %cst_55 {dimension_numbers = #tpu.dot_dimension_numbers<[1], [0], [0], [1], [0, 0, 1, 1], [], []>} : vector<16x128xbf16>, vector<128x128xbf16>, vector<16x128xf32> -> vector<16x128xf32>
    %c0_56 = arith.constant 0 : index
    %c0_57 = arith.constant 0 : index
    %149 = vector.load %arg12[%c0_56, %c0_57] : memref<1x128xf32, #tpu.memory_space<vmem>>, vector<1x128xf32>
    %150 = vector.broadcast %149 : vector<1x128xf32> to vector<16x128xf32>
    %151 = arith.addf %148, %150 : vector<16x128xf32>
    %152 = arith.addf %19, %151 : vector<16x128xf32>
    %c0_58 = arith.constant 0 : index
    %c0_59 = arith.constant 0 : index
    %153 = vector.load %arg13[%c0_58, %c0_59] : memref<1x128xf32, #tpu.memory_space<vmem>>, vector<1x128xf32>
    %c0_60 = arith.constant 0 : index
    %c0_61 = arith.constant 0 : index
    %154 = vector.load %arg14[%c0_60, %c0_61] : memref<1x128xf32, #tpu.memory_space<vmem>>, vector<1x128xf32>
    %cst_62 = arith.constant dense<0.000000e+00> : vector<16xf32>
    %155 = vector.multi_reduction <add>, %152, %cst_62 [1] : vector<16x128xf32> to vector<16xf32>
    %156 = vector.shape_cast %155 : vector<16xf32> to vector<16x1xf32>
    %cst_63 = arith.constant 1.280000e+02 : f32
    %157 = vector.broadcast %cst_63 : f32 to vector<16x1xf32>
    %158 = arith.divf %156, %157 : vector<16x1xf32>
    %159 = vector.broadcast %158 : vector<16x1xf32> to vector<16x128xf32>
    %160 = arith.subf %152, %159 : vector<16x128xf32>
    %161 = arith.mulf %160, %160 : vector<16x128xf32>
    %cst_64 = arith.constant dense<0.000000e+00> : vector<16xf32>
    %162 = vector.multi_reduction <add>, %161, %cst_64 [1] : vector<16x128xf32> to vector<16xf32>
    %163 = vector.shape_cast %162 : vector<16xf32> to vector<16x1xf32>
    %cst_65 = arith.constant 1.280000e+02 : f32
    %164 = vector.broadcast %cst_65 : f32 to vector<16x1xf32>
    %165 = arith.divf %163, %164 : vector<16x1xf32>
    %166 = vector.broadcast %158 : vector<16x1xf32> to vector<16x128xf32>
    %167 = arith.subf %152, %166 : vector<16x128xf32>
    %cst_66 = arith.constant 9.99999974E-6 : f32
    %168 = vector.broadcast %cst_66 : f32 to vector<16x1xf32>
    %169 = arith.addf %165, %168 : vector<16x1xf32>
    %170 = math.rsqrt %169 : vector<16x1xf32>
    %171 = vector.broadcast %170 : vector<16x1xf32> to vector<16x128xf32>
    %172 = arith.mulf %167, %171 : vector<16x128xf32>
    %173 = vector.broadcast %153 : vector<1x128xf32> to vector<16x128xf32>
    %174 = arith.mulf %172, %173 : vector<16x128xf32>
    %175 = vector.broadcast %154 : vector<1x128xf32> to vector<16x128xf32>
    %176 = arith.addf %174, %175 : vector<16x128xf32>
    %177 = arith.truncf %176 : vector<16x128xf32> to vector<16x128xbf16>
    %c0_67 = arith.constant 0 : index
    %c0_68 = arith.constant 0 : index
    %178 = vector.load %arg15[%c0_67, %c0_68] : memref<128x256xbf16, #tpu.memory_space<vmem>>, vector<128x256xbf16>
    %cst_69 = arith.constant dense<0.000000e+00> : vector<16x256xf32>
    %179 = tpu.matmul %177, %178, %cst_69 {dimension_numbers = #tpu.dot_dimension_numbers<[1], [0], [0], [1], [0, 0, 1, 1], [], []>} : vector<16x128xbf16>, vector<128x256xbf16>, vector<16x256xf32> -> vector<16x256xf32>
    %c0_70 = arith.constant 0 : index
    %c0_71 = arith.constant 0 : index
    %180 = vector.load %arg16[%c0_70, %c0_71] : memref<1x256xf32, #tpu.memory_space<vmem>>, vector<1x256xf32>
    %181 = vector.broadcast %180 : vector<1x256xf32> to vector<16x256xf32>
    %182 = arith.addf %179, %181 : vector<16x256xf32>
    %183 = arith.mulf %182, %182 : vector<16x256xf32>
    %184 = arith.mulf %182, %183 : vector<16x256xf32>
    %cst_72 = arith.constant 4.471500e-02 : f32
    %185 = vector.broadcast %cst_72 : f32 to vector<16x256xf32>
    %186 = arith.mulf %185, %184 : vector<16x256xf32>
    %187 = arith.addf %182, %186 : vector<16x256xf32>
    %cst_73 = arith.constant 0.797884583 : f32
    %188 = vector.broadcast %cst_73 : f32 to vector<16x256xf32>
    %189 = arith.mulf %188, %187 : vector<16x256xf32>
    %190 = math.tanh %189 : vector<16x256xf32>
    %cst_74 = arith.constant 1.000000e+00 : f32
    %191 = vector.broadcast %cst_74 : f32 to vector<16x256xf32>
    %192 = arith.addf %191, %190 : vector<16x256xf32>
    %cst_75 = arith.constant 5.000000e-01 : f32
    %193 = vector.broadcast %cst_75 : f32 to vector<16x256xf32>
    %194 = arith.mulf %193, %192 : vector<16x256xf32>
    %195 = arith.mulf %182, %194 : vector<16x256xf32>
    %196 = arith.truncf %195 : vector<16x256xf32> to vector<16x256xbf16>
    %c0_76 = arith.constant 0 : index
    %c0_77 = arith.constant 0 : index
    %197 = vector.load %arg17[%c0_76, %c0_77] : memref<256x128xbf16, #tpu.memory_space<vmem>>, vector<256x128xbf16>
    %cst_78 = arith.constant dense<0.000000e+00> : vector<16x128xf32>
    %198 = tpu.matmul %196, %197, %cst_78 {dimension_numbers = #tpu.dot_dimension_numbers<[1], [0], [0], [1], [0, 0, 1, 1], [], []>} : vector<16x256xbf16>, vector<256x128xbf16>, vector<16x128xf32> -> vector<16x128xf32>
    %c0_79 = arith.constant 0 : index
    %c0_80 = arith.constant 0 : index
    %199 = vector.load %arg18[%c0_79, %c0_80] : memref<1x128xf32, #tpu.memory_space<vmem>>, vector<1x128xf32>
    %200 = vector.broadcast %199 : vector<1x128xf32> to vector<16x128xf32>
    %201 = arith.addf %198, %200 : vector<16x128xf32>
    %202 = arith.addf %152, %201 : vector<16x128xf32>
    %203 = arith.truncf %202 : vector<16x128xf32> to vector<16x128xbf16>
    %c0_81 = arith.constant 0 : index
    %c0_82 = arith.constant 0 : index
    %c0_83 = arith.constant 0 : index
    %204 = vector.load %arg19[%c0_81, %c0_82, %c0_83] : memref<1x16x128xbf16, #tpu.memory_space<vmem>>, vector<1x16x128xbf16>
    %205 = vector.shape_cast %204 : vector<1x16x128xbf16> to vector<16x128xbf16>
    %206 = vector.shape_cast %203 : vector<16x128xbf16> to vector<1x16x128xbf16>
    tpu.vector_store %arg19[%c0_81, %c0_82, %c0_83], %206 {strides = array<i32>} : memref<1x16x128xbf16, #tpu.memory_space<vmem>>, vector<1x16x128xbf16>,
    return
  }
  func.func @transform_0(%arg0: i32) -> (i32, i32, i32) {
    %c0_i32 = arith.constant 0 : i32
    %c0_i32_0 = arith.constant 0 : i32
    %c0_i32_1 = arith.constant 0 : i32
    return %arg0, %c0_i32, %c0_i32_0 : i32, i32, i32
  }
  func.func @transform_1(%arg0: i32) -> (i32, i32, i32) {
    %c0_i32 = arith.constant 0 : i32
    %c0_i32_0 = arith.constant 0 : i32
    %c0_i32_1 = arith.constant 0 : i32
    return %arg0, %c0_i32, %c0_i32_0 : i32, i32, i32
  }
  func.func @transform_2(%arg0: i32) -> (i32, i32, i32) {
    %c0_i32 = arith.constant 0 : i32
    %c0_i32_0 = arith.constant 0 : i32
    %c0_i32_1 = arith.constant 0 : i32
    return %arg0, %c0_i32, %c0_i32_0 : i32, i32, i32
  }
  func.func @transform_3(%arg0: i32) -> (i32, i32) {
    %c0_i32 = arith.constant 0 : i32
    %c0_i32_0 = arith.constant 0 : i32
    %c0_i32_1 = arith.constant 0 : i32
    return %c0_i32, %c0_i32_0 : i32, i32
  }
  func.func @transform_4(%arg0: i32) -> (i32, i32) {
    %c0_i32 = arith.constant 0 : i32
    %c0_i32_0 = arith.constant 0 : i32
    %c0_i32_1 = arith.constant 0 : i32
    return %c0_i32, %c0_i32_0 : i32, i32
  }
  func.func @transform_5(%arg0: i32) -> (i32, i32) {
    %c0_i32 = arith.constant 0 : i32
    %c0_i32_0 = arith.constant 0 : i32
    %c0_i32_1 = arith.constant 0 : i32
    return %c0_i32, %c0_i32_0 : i32, i32
  }
  func.func @transform_6(%arg0: i32) -> (i32, i32) {
    %c0_i32 = arith.constant 0 : i32
    %c0_i32_0 = arith.constant 0 : i32
    %c0_i32_1 = arith.constant 0 : i32
    return %c0_i32, %c0_i32_0 : i32, i32
  }
  func.func @transform_7(%arg0: i32) -> (i32, i32) {
    %c0_i32 = arith.constant 0 : i32
    %c0_i32_0 = arith.constant 0 : i32
    %c0_i32_1 = arith.constant 0 : i32
    return %c0_i32, %c0_i32_0 : i32, i32
  }
  func.func @transform_8(%arg0: i32) -> (i32, i32) {
    %c0_i32 = arith.constant 0 : i32
    %c0_i32_0 = arith.constant 0 : i32
    %c0_i32_1 = arith.constant 0 : i32
    return %c0_i32, %c0_i32_0 : i32, i32
  }
  func.func @transform_9(%arg0: i32) -> (i32, i32) {
    %c0_i32 = arith.constant 0 : i32
    %c0_i32_0 = arith.constant 0 : i32
    %c0_i32_1 = arith.constant 0 : i32
    return %c0_i32, %c0_i32_0 : i32, i32
  }
  func.func @transform_10(%arg0: i32) -> (i32, i32) {
    %c0_i32 = arith.constant 0 : i32
    %c0_i32_0 = arith.constant 0 : i32
    %c0_i32_1 = arith.constant 0 : i32
    return %c0_i32, %c0_i32_0 : i32, i32
  }
  func.func @transform_11(%arg0: i32) -> (i32, i32) {
    %c0_i32 = arith.constant 0 : i32
    %c0_i32_0 = arith.constant 0 : i32
    %c0_i32_1 = arith.constant 0 : i32
    return %c0_i32, %c0_i32_0 : i32, i32
  }
  func.func @transform_12(%arg0: i32) -> (i32, i32) {
    %c0_i32 = arith.constant 0 : i32
    %c0_i32_0 = arith.constant 0 : i32
    %c0_i32_1 = arith.constant 0 : i32
    return %c0_i32, %c0_i32_0 : i32, i32
  }
  func.func @transform_13(%arg0: i32) -> (i32, i32) {
    %c0_i32 = arith.constant 0 : i32
    %c0_i32_0 = arith.constant 0 : i32
    %c0_i32_1 = arith.constant 0 : i32
    return %c0_i32, %c0_i32_0 : i32, i32
  }
  func.func @transform_14(%arg0: i32) -> (i32, i32) {
    %c0_i32 = arith.constant 0 : i32
    %c0_i32_0 = arith.constant 0 : i32
    %c0_i32_1 = arith.constant 0 : i32
    return %c0_i32, %c0_i32_0 : i32, i32
  }
  func.func @transform_15(%arg0: i32) -> (i32, i32) {
    %c0_i32 = arith.constant 0 : i32
    %c0_i32_0 = arith.constant 0 : i32
    %c0_i32_1 = arith.constant 0 : i32
    return %c0_i32, %c0_i32_0 : i32, i32
  }
  func.func @transform_16(%arg0: i32) -> (i32, i32) {
    %c0_i32 = arith.constant 0 : i32
    %c0_i32_0 = arith.constant 0 : i32
    %c0_i32_1 = arith.constant 0 : i32
    return %c0_i32, %c0_i32_0 : i32, i32
  }
  func.func @transform_17(%arg0: i32) -> (i32, i32) {
    %c0_i32 = arith.constant 0 : i32
    %c0_i32_0 = arith.constant 0 : i32
    %c0_i32_1 = arith.constant 0 : i32
    return %c0_i32, %c0_i32_0 : i32, i32
  }
  func.func @transform_18(%arg0: i32) -> (i32, i32, i32) {
    %c0_i32 = arith.constant 0 : i32
    %c0_i32_0 = arith.constant 0 : i32
    %c0_i32_1 = arith.constant 0 : i32
    return %arg0, %c0_i32, %c0_i32_0 : i32, i32, i32
  }
}

</mosaic_0001>

<bundles_post_ra>
// kernel: tpu_custom_call.1
= control target key start
LH: loop header
LB: loop body
LE: loop exit
PB: predicated region body
PF: predicated region fallthrough
CT: control target
= control target key end

     0   :  { %s3992_s0 = inlined_call_operand.hbm [shape: bf16[4,8,128], index: 0, kind: input, shape index: {}]   ;;  %s3993_s1 = inlined_call_operand.hbm [shape: bf16[4,8,128], index: 1, kind: input, shape index: {}]   ;;  %s3994_s2 = inlined_call_operand.vmem [shape: f32[4,1,16], index: 2, kind: input, shape index: {}]   ;;  %s3995_s3 = inlined_call_operand.hbm [shape: f32[16,128], index: 3, kind: input, shape index: {}]   ;;  %s3996_s4 = inlined_call_operand.hbm [shape: bf16[128,128], index: 4, kind: input, shape index: {}]   ;;  %s3997_s5 = inlined_call_operand.vmem [shape: f32[1,128], index: 5, kind: input, shape index: {}]   ;;  %s3998_s6 = inlined_call_operand.vmem [shape: f32[1,128], index: 6, kind: input, shape index: {}]   ;;  %s3999_s7 = inlined_call_operand.vmem [shape: f32[1,128], index: 7, kind: input, shape index: {}]   ;;  %s4000_s8 = inlined_call_operand.hbm [shape: bf16[128,384], index: 8, kind: input, shape index: {}]   ;;  %s4001_s9 = inlined_call_operand.vmem [shape: f32[1,384], index: 9, kind: input, shape index: {}]   ;;  %s4002_s10 = inlined_call_operand.hbm [shape: bf16[128,128], index: 10, kind: input, shape index: {}]   ;;  %s4003_s11 = inlined_call_operand.vmem [shape: f32[1,128], index: 11, kind: input, shape index: {}]   ;;  %s4004_s12 = inlined_call_operand.vmem [shape: f32[1,128], index: 12, kind: input, shape index: {}]   ;;  %s4005_s13 = inlined_call_operand.vmem [shape: f32[1,128], index: 13, kind: input, shape index: {}]   ;;  %s4006_s14 = inlined_call_operand.hbm [shape: bf16[128,256], index: 14, kind: input, shape index: {}]   ;;  %s4007_s15 = inlined_call_operand.vmem [shape: f32[1,256], index: 15, kind: input, shape index: {}]   ;;  %s4008_s16 = inlined_call_operand.hbm [shape: bf16[256,128], index: 16, kind: input, shape index: {}]   ;;  %s4009_s17 = inlined_call_operand.vmem [shape: f32[1,128], index: 17, kind: input, shape index: {}]   ;;  %s4010_s18 = inlined_call_operand.hbm [shape: bf16[4,16,128], index: 18, kind: output, shape index: {}]  }
   0x1   :  { %4022 = sst [smem:[#allocation26_spill]] %s3992_s0 }
   0x2   :  { %4023 = sst [smem:[#allocation27_spill]] %s3993_s1 }
   0x3   :  { %4024 = sst [smem:[#allocation28_spill]] %s3994_s2 }
   0x4   :  { %4025 = sst [smem:[#allocation29_spill]] %s3995_s3 }
   0x5   :  { %4026 = sst [smem:[#allocation30_spill]] %s3996_s4 }
   0x6   :  { %4027 = sst [smem:[#allocation31_spill]] %s4000_s8 }
   0x7   :  { %4028 = sst [smem:[#allocation32_spill]] %s4001_s9 }
   0x8   :  { %4029 = sst [smem:[#allocation33_spill]] %s4002_s10 }
   0x9   :  { %4030 = sst [smem:[#allocation34_spill]] %s4003_s11 }
   0xa   :  { %4031 = sst [smem:[#allocation35_spill]] %s4004_s12 }
   0xb   :  { %4032 = sst [smem:[#allocation36_spill]] %s4005_s13 }
   0xc   :  { %4033 = sst [smem:[#allocation37_spill]] %s4006_s14 }
   0xd   :  { %4034 = sst [smem:[#allocation38_spill]] %s4007_s15 }
   0xe   :  { %4035 = sst [smem:[#allocation39_spill]] %s4008_s16 }
   0xf   :  { %4036 = sst [smem:[#allocation40_spill]] %s4009_s17 }
  0x10   :  { %4037 = sst [smem:[#allocation41_spill]] %s4010_s18 }
  0x11   :  { %23 = vsyncpa [#allocation4], 0 }
  0x12   :  { %25 = vsyncpa [#allocation4 + $0x1], 0 }
  0x13   :  { %26 = vsyncpa [#allocation7], 0 }
  0x14   :  { %28 = vsyncpa [#allocation7 + $0x1], 0 }
  0x15   :  { %29 = vsyncpa [#allocation10], 0 }
  0x16   :  { %30 = vsyncpa [#allocation13], 0 }
  0x17   :  { %31 = vsyncpa [#allocation16], 0 }
  0x18   :  { %32 = vsyncpa [#allocation5], 0 }
  0x19   :  { %34 = vsyncpa [#allocation5 + $0x1], 0  ;;  %s3379_s27 = smov 0   ;;  %s3381_s28 = smov 0  }
  0x1a   :  { %s3383_s29 = smov 0   ;;  %s3385_s30 = smov 0  }
  0x1b LB: > { %s3262_s0 = smov [#allocation8]   ;;  %s3400_s1 = sadd.s32 4294967295, %s3260_s30   ;;  %s3260_s30 = sphi %s3385_s30, %s4084_s30   ;;  %s3256_s29 = sphi %s3383_s29, %s4083_s29   ;;  %s3252_s28 = sphi %s3381_s28, %s4082_s28   ;;  %s3248_s27 = sphi %s3379_s27, %s4081_s27  }
  0x1c   : > { %s476_s19 = sshll.u32 %s3262_s0, 4  ;;  %p2387_p0 = scmp.ge.s32.totalorder %s3260_s30, 1  ;;  %s3405_s19 = int_to_ptr.vmem [resolvable:$true] %s476_s19 }
  0x1d   : > { %p4015_p1 = scmp.eq.s32.totalorder %s3400_s1, 0  ;;  %p464_p2 = scmp.lt.s32.totalorder %s3260_s30, 5 }
  0x1e   : > { %s3263_s21 = smov [#allocation9]   ;;  %s3264_s23 = smov [#allocation12]  }
  0x1f   : > { %p3407_p3 = pnand %p2387_p0, %p464_p2  ;;  %s489_s22 = sshll.u32 %s3263_s21, 4  ;;  %s3419_s22 = int_to_ptr.vmem [resolvable:$true] %s489_s22 }
  0x20   : > { %s3421_s24 = sshll.u32 %s3264_s23, 4  ;;  %s4040_s3 = sld [smem:[#allocation29_spill]]  ;;  %s528_s24 = int_to_ptr.vmem [resolvable:$true] %s3421_s24 }
  0x21   : > { %s4038_s20 = scalar_select %p3407_p3, 1, 0 }
  0x22   : > { %p2715_p4 = pneg %p3407_p3 }
  0x24   : > { %p3415_p5 = pnand %p2715_p4, %p4015_p1 }
  0x26   : > { %s2946_s0 = scalar_lea.hbm %s4040_s3, 256  ;;  %p3431_p7 = pneg %p3415_p5 }
  0x27   : > { %p2947_p6 = scmp.ne.s32.totalorder %s4040_s3, %s2946_s0  ;;  %p2953_p10 = scmp.lt.u32.totalorder %s2946_s0, %s4040_s3 }
  0x29   : > { %p2949_p8 = pnand %p3431_p7, %p2947_p6 }
  0x2b   : > { %p2950_p9 = pneg %p2949_p8 }
  0x2d   : > { %p2955_p11 = pnand %p2953_p10, %p2950_p9 }
  0x2f   : > { %2958 = shalt.err (!%p2955_p11)
}
  0x30   : > { %s2959_s17 = scalar_lea.vmem %s3405_s19, 256  ;;  %p2967_p2 = scmp.lt.s32.totalorder %s3405_s19, %s3405_s19 }
  0x31   : > { %p2960_p12 = scmp.ne.s32.totalorder %s3405_s19, %s2959_s17  ;;  %p2968_p4 = scmp.lt.s32.totalorder %s2959_s17, %s2959_s17 }
  0x33   : > { %p2962_p13 = pnand %p2960_p12, %p3431_p7  ;;  %p2969_p6 = por %p2968_p4, %p2967_p2 }
  0x35   : > { %p2963_p0 = pneg %p2962_p13 }
  0x37   : > { %p2970_p8 = pnand %p2969_p6, %p2963_p0 }
  0x39   : > { %2973 = shalt.err (!%p2970_p8)
}
  0x3a   : > { %s4014_s18 = smov 128   ;;  %s4017_s15 = smov 8  }
  0x3b   : > { %2718 = dma.hbm_to_vmem [thread:$0]  (!%p3415_p5), %s4040_s3, 256, %s3405_s19, [#allocation7], %s4014_s18, %s4014_s18, %s4017_s15  }
  0x3c   : > { %s4042_s4 = sld [smem:[#allocation30_spill]] }
  0x42   : > { %s2974_s17 = scalar_lea.hbm %s4042_s4, 1024 }
  0x43   : > { %p2975_p9 = scmp.ne.s32.totalorder %s4042_s4, %s2974_s17  ;;  %p2981_p12 = scmp.lt.u32.totalorder %s2974_s17, %s4042_s4 }
  0x45   : > { %p2977_p10 = pnand %p2975_p9, %p3431_p7 }
  0x47   : > { %p2978_p11 = pneg %p2977_p10 }
  0x49   : > { %p2983_p13 = pnand %p2981_p12, %p2978_p11 }
  0x4b   : > { %2986 = shalt.err (!%p2983_p13)
}
  0x4c   : > { %s2987_s19 = scalar_lea.vmem %s3419_s22, 1024  ;;  %p2995_p6 = scmp.lt.s32.totalorder %s3419_s22, %s3419_s22 }
  0x4d   : > { %p2988_p0 = scmp.ne.s32.totalorder %s3419_s22, %s2987_s19  ;;  %p2996_p8 = scmp.lt.s32.totalorder %s2987_s19, %s2987_s19 }
  0x4f   : > { %p2990_p2 = pnand %p2988_p0, %p3431_p7  ;;  %p2997_p9 = por %p2996_p8, %p2995_p6 }
  0x51   : > { %p2991_p4 = pneg %p2990_p2 }
  0x53   : > { %p2998_p10 = pnand %p2997_p9, %p2991_p4 }
  0x55   : > { %3001 = shalt.err (!%p2998_p10)
}
  0x56   : > { %s4018_s12 = smov 64   ;;  %s4019_s9 = smov 4  }
  0x57   : > { %2721 = dma.hbm_to_vmem [thread:$0]  (!%p3415_p5), %s4042_s4, 1024, %s3419_s22, [#allocation10], %s4018_s12, %s4018_s12, %s4019_s9  }
  0x58   : > { %s4043_s10 = sld [smem:[#allocation33_spill]] }
  0x5e   : > { %s3002_s0 = scalar_lea.hbm %s4043_s10, 1024 }
  0x5f   : > { %p3003_p11 = scmp.ne.s32.totalorder %s4043_s10, %s3002_s0  ;;  %p3009_p0 = scmp.lt.u32.totalorder %s3002_s0, %s4043_s10 }
  0x61   : > { %p3005_p12 = pnand %p3003_p11, %p3431_p7 }
  0x63   : > { %p3006_p13 = pneg %p3005_p12 }
  0x65   : > { %p3011_p2 = pnand %p3009_p0, %p3006_p13 }
  0x67   : > { %3014 = shalt.err (!%p3011_p2)
}
  0x68   : > { %s3015_s11 = scalar_lea.vmem %s528_s24, 1024  ;;  %p3023_p9 = scmp.lt.s32.totalorder %s528_s24, %s528_s24 }
  0x69   : > { %p3016_p4 = scmp.ne.s32.totalorder %s528_s24, %s3015_s11  ;;  %p3024_p10 = scmp.lt.s32.totalorder %s3015_s11, %s3015_s11 }
  0x6b   : > { %p3018_p6 = pnand %p3016_p4, %p3431_p7  ;;  %p3025_p1 = por %p3024_p10, %p3023_p9 }
  0x6d   : > { %p3019_p8 = pneg %p3018_p6 }
  0x6f   : > { %p3026_p3 = pnand %p3025_p1, %p3019_p8 }
  0x71   : > { %3029 = shalt.err (!%p3026_p3)
}
  0x72   : > { %2727 = dma.hbm_to_vmem [thread:$0]  (!%p3415_p5), %s4043_s10, 1024, %s528_s24, [#allocation13], %s4018_s12, %s4018_s12, %s4019_s9  }
  0x73   : > { %s3269_s13 = smov [#allocation11]   ;;  %s4044_s8 = sld [smem:[#allocation31_spill]] }
  0x74   : > { %s511_s25 = sshll.u32 %s3269_s13, 4  ;;  %s512_s25 = int_to_ptr.vmem [resolvable:$true] %s511_s25 }
  0x79   : > { %s3030_s23 = scalar_lea.hbm %s4044_s8, 3072 }
  0x7a   : > { %p3031_p1 = scmp.ne.s32.totalorder %s4044_s8, %s3030_s23  ;;  %p3037_p12 = scmp.lt.u32.totalorder %s3030_s23, %s4044_s8 }
  0x7c   : > { %p3033_p3 = pnand %p3031_p1, %p3431_p7 }
  0x7e   : > { %p3034_p11 = pneg %p3033_p3 }
  0x80   : > { %p3039_p13 = pnand %p3037_p12, %p3034_p11 }
  0x82   : > { %3042 = shalt.err (!%p3039_p13)
}
  0x83   : > { %s3043_s24 = scalar_lea.vmem %s512_s25, 3072  ;;  %p3051_p6 = scmp.lt.s32.totalorder %s512_s25, %s512_s25 }
  0x84   : > { %p3044_p0 = scmp.ne.s32.totalorder %s512_s25, %s3043_s24  ;;  %p3052_p8 = scmp.lt.s32.totalorder %s3043_s24, %s3043_s24 }
  0x86   : > { %p3046_p2 = pnand %p3044_p0, %p3431_p7  ;;  %p3053_p9 = por %p3052_p8, %p3051_p6 }
  0x88   : > { %p3047_p4 = pneg %p3046_p2 }
  0x8a   : > { %p3054_p10 = pnand %p3053_p9, %p3047_p4 }
  0x8c   : > { %3057 = shalt.err (!%p3054_p10)
}
  0x8d   : > { %s3270_s22 = smov 192   ;;  %s3271_s18 = smov 12  }
  0x8e   : > { %2724 = dma.hbm_to_vmem [thread:$0]  (!%p3415_p5), %s4044_s8, 3072, %s512_s25, [#allocation10], %s3270_s22, %s3270_s22, %s3271_s18  }
  0x8f   : > { %s3272_s26 = smov [#allocation14]   ;;  %s3273_s23 = smov [#allocation15]  }
  0x90   : > { %s549_s0 = sshll.u32 %s3272_s26, 4  ;;  %s565_s17 = sshll.u32 %s3273_s23, 4  ;;  %s550_s0 = int_to_ptr.vmem [resolvable:$true] %s549_s0  ;;  %s3521_s17 = int_to_ptr.vmem [resolvable:$true] %s565_s17 }
  0x91   : > { %s4045_s14 = sld [smem:[#allocation37_spill]] }
  0x97   : > { %s3058_s24 = scalar_lea.hbm %s4045_s14, 2048 }
  0x98   : > { %p3059_p1 = scmp.ne.s32.totalorder %s4045_s14, %s3058_s24  ;;  %p3065_p12 = scmp.lt.u32.totalorder %s3058_s24, %s4045_s14 }
  0x9a   : > { %p3061_p3 = pnand %p3059_p1, %p3431_p7 }
  0x9c   : > { %p3062_p11 = pneg %p3061_p3 }
  0x9e   : > { %p3067_p13 = pnand %p3065_p12, %p3062_p11 }
  0xa0   : > { %3070 = shalt.err (!%p3067_p13)
}
  0xa1   : > { %s3071_s22 = scalar_lea.vmem %s550_s0, 2048  ;;  %p3079_p6 = scmp.lt.s32.totalorder %s550_s0, %s550_s0 }
  0xa2   : > { %p3072_p0 = scmp.ne.s32.totalorder %s550_s0, %s3071_s22  ;;  %p3080_p8 = scmp.lt.s32.totalorder %s3071_s22, %s3071_s22 }
  0xa4   : > { %p3074_p2 = pnand %p3072_p0, %p3431_p7  ;;  %p3081_p9 = por %p3080_p8, %p3079_p6 }
  0xa6   : > { %p3075_p4 = pneg %p3074_p2 }
  0xa8   : > { %p3082_p10 = pnand %p3081_p9, %p3075_p4 }
  0xaa   : > { %3085 = shalt.err (!%p3082_p10)
}
  0xab   : > { %s4046_s12 = smov 8   ;;  %s4047_s9 = smov 128  }
  0xac   : > { %2730 = dma.hbm_to_vmem [thread:$0]  (!%p3415_p5), %s4045_s14, 2048, %s550_s0, [#allocation13], %s4047_s9, %s4047_s9, %s4046_s12  }
  0xad   : > { %s4048_s16 = sld [smem:[#allocation39_spill]] }
  0xb3   : > { %s3086_s19 = scalar_lea.hbm %s4048_s16, 2048 }
  0xb4   : > { %p3087_p1 = scmp.ne.s32.totalorder %s4048_s16, %s3086_s19  ;;  %p3093_p12 = scmp.lt.u32.totalorder %s3086_s19, %s4048_s16 }
  0xb6   : > { %p3089_p3 = pnand %p3087_p1, %p3431_p7 }
  0xb8   : > { %p3090_p11 = pneg %p3089_p3 }
  0xba   : > { %p3095_p13 = pnand %p3093_p12, %p3090_p11 }
  0xbc   : > { %3098 = shalt.err (!%p3095_p13)
}
  0xbd   : > { %s3099_s0 = scalar_lea.vmem %s3521_s17, 2048  ;;  %p3107_p6 = scmp.lt.s32.totalorder %s3521_s17, %s3521_s17 }
  0xbe   : > { %p3100_p0 = scmp.ne.s32.totalorder %s3521_s17, %s3099_s0  ;;  %p3108_p8 = scmp.lt.s32.totalorder %s3099_s0, %s3099_s0 }
  0xc0   : > { %p3102_p2 = pnand %p3100_p0, %p3431_p7  ;;  %p3109_p9 = por %p3108_p8, %p3107_p6 }
  0xc2   : > { %p3103_p4 = pneg %p3102_p2 }
  0xc4   : > { %p3110_p10 = pnand %p3109_p9, %p3103_p4 }
  0xc6   : > { %3113 = shalt.err (!%p3110_p10)
}
  0xc7   : > { %s4049_s22 = smov 4   ;;  %s4050_s12 = smov 64  }
  0xc8   : > { %2733 = dma.hbm_to_vmem [thread:$0]  (!%p3415_p5), %s4048_s16, 2048, %s3521_s17, [#allocation16], %s4050_s12, %s4050_s12, %s4049_s22  }
  0xc9   : > { %s2386_s2 = sadd.s32 4294967294, %s3260_s30   ;;  %s3572_s21 = sadd.s32 1, %s3260_s30  }
  0xca   : > { %s44_s13 = ssub.s32 %s3260_s30, %s3572_s21  ;;  %s47_s26 = sadd.s32 1, %s3256_s29 }
  0xcb   : > { %p45_p7 = scmp.eq.s32.totalorder %s44_s13, 0  ;;  %p54_p1 = scmp.ne.s32.totalorder %s3256_s29, %s3252_s28 }
  0xcc   : > { %p55_p3 = scmp.eq.s32.totalorder %s3260_s30, 0  ;;  %p60_p11 = scmp.ne.s32.totalorder %s3252_s28, %s3248_s27 }
  0xcd   : > { %s3583_s23 = scalar_select %p45_p7, %s3256_s29, %s47_s26  }
  0xce   : > { %p3585_p12 = por %p55_p3, %p54_p1  ;;  %p4053_p13 = scmp.eq.s32.totalorder %s3400_s1, 0 }
  0xcf   : > { %4051 = sst [smem:[#allocation25_spill]] %s3583_s23  ;;  %p451_p0 = scmp.eq.s32.totalorder %s3400_s1, 3 }
  0xd0   : > { %p3591_p5 = por %p4053_p13, %p60_p11  ;;  %p457_p2 = scmp.eq.s32.totalorder %s2386_s2, 3 }
  0xd1   : > { %p2751_p4 = scmp.lt.s32.totalorder %s3260_s30, 4  ;;  %s582_s11 = sand.u32 1, %s3256_s29  }
  0xd2   : > { %s4054_s17 = scalar_select %p3591_p5, 1, 0 }
  0xd3   : > { %p3598_p6 = por %p451_p0, %p54_p1  ;;  %p3602_p8 = por %p457_p2, %p60_p11 }
  0xd4   : > { %s3606_s25 = sshll.u32 %s582_s11, 2  ;;  %s2396_s0 = sshll.u32 %s3260_s30, 6 }
  0xd5   : > { %s4055_s24 = scalar_select %p3598_p6, 1, 0 }
  0xd6   : > { %s4056_s15 = scalar_select %p3602_p8, 1, 0 }
  0xd7   : > { %s4057_s9 = sld [smem:[#allocation26_spill]]  ;;  %s586_s2 = scalar_lea.vmem [#allocation3], %s3606_s25 }
  0xd8   : > { %s593_s13 = sshll.u32 %s586_s2, 4  ;;  %p3619_p9 = pnand %p2751_p4, %p3585_p12  ;;  %s3615_s13 = int_to_ptr.vmem [resolvable:$true] %s593_s13 }
  0xd9   : > { %s4059_s8 = sld [smem:[#allocation27_spill]]  ;;  %s600_s12 = sand.u32 1, %s3260_s30  }
  0xda   : > { %s583_s10 = scalar_lea.sflag [#allocation4], %s582_s11  ;;  %p3116_p7 = pneg %p3619_p9 }
  0xdd   : > { %s3612_s18 = scalar_lea.hbm %s4057_s9, %s2396_s0  ;;  %s3119_s16 = scalar_lea.hbm %s4057_s9, 256 }
  0xde   : > { %s3114_s14 = scalar_lea.hbm %s3612_s18, 64  ;;  %p3120_p11 = scmp.lt.u32.totalorder %s3612_s18, %s4057_s9 }
  0xdf   : > { %s3626_s22 = scalar_lea.hbm %s4059_s8, %s2396_s0  ;;  %p3115_p10 = scmp.ne.s32.totalorder %s3612_s18, %s3114_s14 }
  0xe0   : > { %p3121_p12 = scmp.lt.u32.totalorder %s3119_s16, %s3114_s14  ;;  %p3123_p0 = scmp.lt.u32.totalorder %s3114_s14, %s3612_s18 }
  0xe1   : > { %p3117_p1 = pnand %p3116_p7, %p3115_p10 }
  0xe2   : > { %p3122_p13 = por %p3121_p12, %p3120_p11 }
  0xe3   : > { %p3118_p3 = pneg %p3117_p1 }
  0xe4   : > { %p3124_p2 = por %p3123_p0, %p3122_p13 }
  0xe6   : > { %p3125_p4 = pnand %p3124_p2, %p3118_p3 }
  0xe8   : > { %3128 = shalt.err (!%p3125_p4)
}
  0xe9   : > { %s3129_s4 = scalar_lea.vmem %s3615_s13, 64  ;;  %s3274_s11 = smov [#allocation3]  }
  0xea   : > { %p3130_p10 = scmp.ne.s32.totalorder %s3615_s13, %s3129_s4  ;;  %s3134_s0 = sshll.u32 %s3274_s11, 4  ;;  %s3135_s0 = int_to_ptr.vmem [resolvable:$false] %s3134_s0 }
  0xeb   : > { %s3136_s23 = scalar_lea.vmem %s3135_s0, 128  ;;  %p3137_p6 = scmp.lt.s32.totalorder %s3615_s13, %s3135_s0 }
  0xec   : > { %p3132_p1 = pnand %p3130_p10, %p3116_p7  ;;  %p3138_p11 = scmp.lt.s32.totalorder %s3136_s23, %s3129_s4 }
  0xee   : > { %p3133_p8 = pneg %p3132_p1  ;;  %p3139_p12 = por %p3138_p11, %p3137_p6 }
  0xf0   : > { %p3140_p13 = pnand %p3139_p12, %p3133_p8 }
  0xf2   : > { %3143 = shalt.err (!%p3140_p13)
}
  0xf3   : > { %2737 = dma.hbm_to_vmem [thread:$0]  (!%p3619_p9), %s3612_s18, 64, %s3615_s13, %s583_s10  }
  0xf4   : > { %s604_s14 = scalar_lea.vmem [#allocation6], %s3606_s25  ;;  %s601_s19 = scalar_lea.sflag [#allocation7], %s600_s12 }
  0xf5   : > { %s611_s16 = sshll.u32 %s604_s14, 4  ;;  %s3144_s2 = scalar_lea.hbm %s3626_s22, 64  ;;  %s612_s16 = int_to_ptr.vmem [resolvable:$true] %s611_s16 }
  0xf6   : > { %p3145_p6 = scmp.ne.s32.totalorder %s3626_s22, %s3144_s2  ;;  %s3149_s11 = scalar_lea.hbm %s4059_s8, 256 }
  0xf7   : > { %p3150_p0 = scmp.lt.u32.totalorder %s3626_s22, %s4059_s8  ;;  %p3151_p2 = scmp.lt.u32.totalorder %s3149_s11, %s3144_s2 }
  0xf8   : > { %p3147_p8 = pnand %p3145_p6, %p3116_p7  ;;  %p3153_p10 = scmp.lt.u32.totalorder %s3144_s2, %s3626_s22 }
  0xf9   : > { %p3152_p4 = por %p3151_p2, %p3150_p0 }
  0xfa   : > { %p3148_p3 = pneg %p3147_p8 }
  0xfb   : > { %p3154_p1 = por %p3153_p10, %p3152_p4 }
  0xfd   : > { %p3155_p11 = pnand %p3154_p1, %p3148_p3 }
  0xff   : > { %3158 = shalt.err (!%p3155_p11)
}
 0x100   : > { %s3159_s10 = scalar_lea.vmem %s612_s16, 64  ;;  %s3275_s25 = smov [#allocation6]  }
 0x101   : > { %p3160_p12 = scmp.ne.s32.totalorder %s612_s16, %s3159_s10  ;;  %s3164_s18 = sshll.u32 %s3275_s25, 4  ;;  %s3165_s18 = int_to_ptr.vmem [resolvable:$false] %s3164_s18 }
 0x102   : > { %s3166_s13 = scalar_lea.vmem %s3165_s18, 128  ;;  %p3167_p8 = scmp.lt.s32.totalorder %s612_s16, %s3165_s18 }
 0x103   : > { %p3162_p13 = pnand %p3160_p12, %p3116_p7  ;;  %p3168_p5 = scmp.lt.s32.totalorder %s3166_s13, %s3159_s10 }
 0x105   : > { %p3163_p6 = pneg %p3162_p13  ;;  %p3169_p0 = por %p3168_p5, %p3167_p8 }
 0x107   : > { %p3170_p2 = pnand %p3169_p0, %p3163_p6 }
 0x109   : > { %3173 = shalt.err (!%p3170_p2)
}
 0x10a   : > { %2740 = dma.hbm_to_vmem [thread:$0]  (!%p3619_p9), %s3626_s22, 64, %s612_s16, %s601_s19  }
 0x10b   : > { %p4060_p3 = scmp.ne.s32.totalorder %s4038_s20, 0 }
 0x10c   : > { %s3679_s12 = sand.u32 (!%p4060_p3), 1, %s3252_s28   ;;  %p4061_p7 = scmp.ne.s32.totalorder (!%p4060_p3), %s4054_s17, 0 }
 0x10d   : > { %626 = sbr.rel (%p4060_p3) target bundleno = 3961 (0xf79), region = 92  ;;  %s2400_s14 = sshll.u32 (!%p4060_p3), %s3679_s12, 2 }
 0x10e   : > { %s629_s2 = scalar_lea.sflag (!%p4060_p3), [#allocation4], %s3679_s12  ;;  %s632_s3 = scalar_lea.vmem (!%p4060_p3), [#allocation3], %s2400_s14 }
 0x114   : > { %3219 = dma.done.wait (%p4061_p7), %s629_s2, 64  }
 0x115   : > { %3221 = vsyncadd (%p4061_p7), %s629_s2, 4294967232  ;;  %s637_s26 = sand.u32 1, %s3400_s1   ;;  %s3688_s20 = scalar_lea.vmem [#allocation6], %s2400_s14 }
 0x116   : > { %s638_s22 = scalar_lea.sflag [#allocation7], %s637_s26 }
 0x117   : > { %3223 = dma.done.wait (%p4061_p7), %s638_s22, 64  }
 0x118   : > { %3225 = vsyncadd (%p4061_p7), %s638_s22, 4294967232  ;;  %p4062_p5 = scmp.eq.s32.totalorder %s3400_s1, 0 }
 0x11a   : > { %3227 = dma.done.wait (%p4062_p5), [#allocation7], 256   ;;  %p4063_p9 = pmov %p4062_p5 }
 0x11b   : > { %p4064_p4 = pmov %p4062_p5 }
 0x11c   : > { %3229 = vsyncadd (%p4063_p9), [#allocation7], 4294967040 }
 0x11d   : > { %3231 = dma.done.wait (%p4064_p4), [#allocation10], 4096   ;;  %p4065_p10 = pmov %p4064_p4 }
 0x11e   : > { %p4066_p1 = pmov %p4064_p4 }
 0x11f   : > { %3233 = vsyncadd (%p4065_p10), [#allocation10], 4294963200 }
 0x120   : > { %3235 = dma.done.wait (%p4066_p1), [#allocation13], 3072   ;;  %p4067_p11 = pmov %p4066_p1 }
 0x121   : > { %p4068_p12 = pmov %p4066_p1 }
 0x122   : > { %3237 = vsyncadd (%p4067_p11), [#allocation13], 4294964224 }
 0x123   : > { %3239 = dma.done.wait (%p4068_p12), [#allocation16], 2048   ;;  %p4069_p13 = pmov %p4066_p1 }
 0x124   : > { %v3276_v0 = vmov 0.0   ;;  %vm3277_vm0 = vmmov 0   ;;  %v2810_v1 = vld [vmem:[#allocation9] sm:$0xff]   ;;  %v2811_v2 = vld [vmem:[#allocation9 + $0x8] sm:$0xff]   ;;  %v2812_v3 = vld [vmem:[#allocation9 + $0x10] sm:$0xff]   ;;  %v3278_v49 = vmov 0  }
 0x125   : > { %3241 = vsyncadd (%p4069_p13), [#allocation16], 4294965248  ;;  %2577 = vmatprep.subr.bf16.mxu0 %v3276_v0  ;;  %2593 = vmatprep.mubr.msk.bf16.mxu0 %vm3277_vm0, %v3276_v0  ;;  %v2813_v4 = vld [vmem:[#allocation9 + $0x18] sm:$0xff]   ;;  %v730_v5 = vld [vmem:[%s632_s3] sm:$0xf]  ;;  %s4070_s25 = sld [smem:[#allocation32_spill]] }
 0x126   : > { %2578 = vmatpush3.bf16.msra.mxu0 %v2810_v1  ;;  %v733_v6 = vld [vmem:[#allocation8] sm:$0xff]  ;;  %v846_v7 = vunpack.c.l.bf16 %v730_v5  ;;  %v2814_v9 = vld [vmem:[#allocation9 + $0x20] sm:$0xff]   ;;  %v2815_v10 = vld [vmem:[#allocation9 + $0x28] sm:$0xff]   ;;  %1104 = vmatprep.mubr.bf16.mxu1 %v3278_v49  ;;  %vm1165_vm1 = vcmask 261120   ;;  %p726_p6 = scmp.lt.s32.totalorder %s3400_s1, 3  ;;  %s4071_s2 = sld [smem:[#allocation28_spill]] }
 0x127   : > { %2579 = vmatprep.subr.bf16.mxu0 %v3276_v0  ;;  %v2816_v11 = vld [vmem:[#allocation9 + $0x30] sm:$0xff]   ;;  %v2817_v12 = vld [vmem:[#allocation9 + $0x38] sm:$0xff]   ;;  %v731_v13 = vld [vmem:[%s3688_s20] sm:$0xf]  ;;  %vm1213_vm2 = vcmask 130048   ;;  %s3279_s26 = smov 96  }
 0x128   : > { %v3716_v8 = vadd.f32 %v846_v7, %v733_v6  ;;  %v2409_v18 = vld [vmem:[%s3997_s5] ss:$0 sm:$0xff]  ;;  %v734_v19 = vld [vmem:[#allocation8 + $0x8] sm:$0xff]  ;;  %v2818_v26 = vld [vmem:[#allocation11 + $0x4] ss:$12 sps:$4 sm:$0xff]   ;;  %s727_s18 = scalar_select %p726_p6, %s3400_s1, 3 }
 0x129   : > { %v2820_v27 = vld [vmem:[#allocation11] ss:$12 sps:$4 sm:$0xff]   ;;  %v2821_v28 = vld [vmem:[#allocation11 + $0x8] ss:$12 sps:$4 sm:$0xff]   ;;  %1072 = vmatprep.subr.bf16.mxu1 %v2818_v26  ;;  %v2824_v31 = vld [vmem:[#allocation11 + $0x18] ss:$12 sps:$4 sm:$0xff]  }
 0x12a   : > { %2580 = vmatpush3.bf16.msra.mxu0 %v2811_v2  ;;  %855 = vadd.xlane.f32.xlu0 %v3716_v8  ;;  %v2822_v29 = vld [vmem:[#allocation11 + $0x1c] ss:$12 sps:$4 sm:$0xff]   ;;  %v2825_v30 = vld [vmem:[#allocation11 + $0x20] ss:$12 sps:$4 sm:$0xff]   ;;  %v2829_v38 = vld [vmem:[#allocation11 + $0x38] ss:$12 sps:$4 sm:$0xff]  }
 0x12b   : > { %2581 = vmatprep.subr.bf16.mxu0 %v3276_v0  ;;  %1073 = vmatpush1.bf16.msra.mxu1 %v2820_v27  ;;  %v2826_v32 = vld [vmem:[#allocation11 + $0x34] ss:$12 sps:$4 sm:$0xff]   ;;  %v2828_v37 = vld [vmem:[#allocation11 + $0x30] ss:$12 sps:$4 sm:$0xff]   ;;  %v2830_v39 = vld [vmem:[#allocation11 + $0x4c] ss:$12 sps:$4 sm:$0xff]  }
 0x12c   : > { %1074 = vmatprep.subr.bf16.mxu1 %v2822_v29  ;;  %v2832_v40 = vld [vmem:[#allocation11 + $0x48] ss:$12 sps:$4 sm:$0xff]   ;;  %v2833_v41 = vld [vmem:[#allocation11 + $0x50] ss:$12 sps:$4 sm:$0xff]   ;;  %v2836_v43 = vld [vmem:[#allocation11 + $0x60] ss:$12 sps:$4 sm:$0xff]   ;;  %s728_s3 = scalar_lea.vmem %s4071_s2, %s727_s18 }
 0x12d   : > { %v2834_v42 = vld [vmem:[#allocation11 + $0x64] ss:$12 sps:$4 sm:$0xff]   ;;  %v2837_v44 = vld [vmem:[#allocation11 + $0x68] ss:$12 sps:$4 sm:$0xff]   ;;  %v2841_v47 = vld [vmem:[#allocation11 + $0x80] ss:$12 sps:$4 sm:$0xff]  }
 0x12e   : > { %2582 = vmatpush3.bf16.msra.mxu0 %v2812_v3  ;;  %v2838_v45 = vld [vmem:[#allocation11 + $0x7c] ss:$12 sps:$4 sm:$0xff]   ;;  %v2840_v46 = vld [vmem:[#allocation11 + $0x78] ss:$12 sps:$4 sm:$0xff]   ;;  %v2842_v48 = vld [vmem:[#allocation11 + $0x94] ss:$12 sps:$4 sm:$0xff]  }
 0x12f   : > { %2583 = vmatprep.subr.bf16.mxu0 %v3276_v0  ;;  %1075 = vmatpush1.bf16.msra.mxu1 %v2824_v31  ;;  %v2844_v50 = vld [vmem:[#allocation11 + $0x90] ss:$12 sps:$4 sm:$0xff]   ;;  %v2845_v51 = vld [vmem:[#allocation11 + $0x98] ss:$12 sps:$4 sm:$0xff]   ;;  %v2848_v53 = vld [vmem:[#allocation11 + $0xa8] ss:$12 sps:$4 sm:$0xff]  }
 0x130   : > { %1076 = vmatprep.subr.bf16.mxu1 %v2826_v32  ;;  %v2846_v52 = vld [vmem:[#allocation11 + $0xac] ss:$12 sps:$4 sm:$0xff]   ;;  %v2849_v54 = vld [vmem:[#allocation11 + $0xb0] ss:$12 sps:$4 sm:$0xff]   ;;  %v2418_v63 = vld [vmem:[%s3998_s6] ss:$0 sm:$0xff] }
 0x131   : > { %s3280_s22 = smov 64   ;;  %s3281_s20 = smov 32   ;;  %vm1671_vm3 = vcmask 523264   ;;  %vm1674_vm4 = vcmask 785408  }
 0x132   : > { %2584 = vmatpush3.bf16.msra.mxu0 %v2813_v4  ;;  %v2419_v4 = vld [vmem:[%s3999_s7] ss:$0 sm:$0xff]  ;;  %s4072_s19 = sld [smem:[#allocation34_spill]]  ;;  %s4073_s0 = sld [smem:[#allocation35_spill]] }
 0x133   : > { %2585 = vmatprep.subr.bf16.mxu0 %v3276_v0  ;;  %1077 = vmatpush1.bf16.msra.mxu1 %v2828_v37  ;;  %s4075_s14 = sld [smem:[#allocation38_spill]]  ;;  %s2506_s17 = sshll.u32 %s3400_s1, 7 }
 0x134   : > { %1078 = vmatprep.subr.bf16.mxu1 %v2830_v39  ;;  %s2211_s10 = scalar_lea.sflag [#allocation5], %s3679_s12  ;;  %p4078_p0 = scmp.ne.s32.totalorder %s4055_s24, 0 }
 0x136   : > { %2586 = vmatpush3.bf16.msra.mxu0 %v2814_v9 }
 0x137   : > { %2587 = vmatprep.subr.bf16.mxu0 %v3276_v0  ;;  %1079 = vmatpush1.bf16.msra.mxu1 %v2832_v40 }
 0x138   : > { %1080 = vmatprep.subr.bf16.mxu1 %v2834_v42 }
 0x13a   : > { %2588 = vmatpush3.bf16.msra.mxu0 %v2815_v10  ;;  %v929_v10 = vlaneseq }
 0x13b   : > { %2589 = vmatprep.subr.bf16.mxu0 %v3276_v0  ;;  %1081 = vmatpush1.bf16.msra.mxu1 %v2836_v43 }
 0x13c   : > { %1082 = vmatprep.subr.bf16.mxu1 %v2838_v45 }
 0x13e   : > { %2590 = vmatpush3.bf16.msra.mxu0 %v2816_v11  ;;  %v3760_v11 = vshrl.u32 %v929_v10, 7 }
 0x13f   : > { %2591 = vmatprep.subr.bf16.mxu0 %v3276_v0  ;;  %1083 = vmatpush1.bf16.msra.mxu1 %v2840_v46 }
 0x140   : > { %1084 = vmatprep.subr.bf16.mxu1 %v2842_v48 }
 0x142   : > { %2592 = vmatpush3.bf16.msra.mxu0 %v2817_v12  ;;  %v931_v12 = vsub.s32 0, %v3760_v11 }
 0x143   : > { %2597 = vmatprep.subr.bf16.mxu0 %v3276_v0  ;;  %1085 = vmatpush1.bf16.msra.mxu1 %v2844_v50 }
 0x144   : > { %1086 = vmatprep.subr.bf16.mxu1 %v2846_v52 }
 0x145   : > { %2594 = vmatmul.mubr.bf16.vlgmr.msra.gmra.mrb[0].mxu0 %v731_v13  ;;  %v939_v13 = vsub.s32 2, %v3760_v11 }
 0x146   : > { %2613 = vmatprep.mubr.msk.bf16.mxu0 %vm3277_vm0, %v3276_v0  ;;  %2598 = vmatpush3.bf16.msra.mxu0 %v2821_v28 }
 0x147   : > { %2599 = vmatprep.subr.bf16.mxu0 %v3276_v0  ;;  %1087 = vmatpush1.bf16.msra.mxu1 %v2848_v53 }
 0x148   : > { %2617 = vmatprep.subr.bf16.mxu1 %v3276_v0 }
 0x14a   : > { %2600 = vmatpush3.bf16.msra.mxu0 %v2825_v30 }
 0x14b   : > { %2601 = vmatprep.subr.bf16.mxu0 %v3276_v0 }
 0x14e   : > { %2602 = vmatpush3.bf16.msra.mxu0 %v2829_v38  ;;  %v3792_v38 = vld [vmem:[%s728_s3] ss:$0 sm:$0xff] }
 0x14f   : > { %2603 = vmatprep.subr.bf16.mxu0 %v3276_v0 }
 0x152   : > { %2604 = vmatpush3.bf16.msra.mxu0 %v2833_v41 }
 0x153   : > { %2605 = vmatprep.subr.bf16.mxu0 %v3276_v0 }
 0x156   : > { %2606 = vmatpush3.bf16.msra.mxu0 %v2837_v44 }
 0x157   : > { %2607 = vmatprep.subr.bf16.mxu0 %v3276_v0 }
 0x15a   : > { %2608 = vmatpush3.bf16.msra.mxu0 %v2841_v47 }
 0x15b   : > { %2609 = vmatprep.subr.bf16.mxu0 %v3276_v0 }
 0x15e   : > { %2610 = vmatpush3.bf16.msra.mxu0 %v2845_v51 }
 0x15f   : > { %2611 = vmatprep.subr.bf16.mxu0 %v3276_v0 }
 0x162   : > { %2612 = vmatpush3.bf16.msra.mxu0 %v2849_v54 }
 0x163   : > { %2665 = vmatprep.subr.bf16.mxu0 %v3276_v0 }
 0x1b7   : > { %v856_v14 = vpop.xlane.xlu0 %855 }
 0x1b8   : > { %v860_v15 = vmul.f32 0.0078125, %v856_v14  ;;  %v927_v14 = vld [vmem:[%s4070_s25] sm:$0x7]  ;;  %s4074_s25 = sld [smem:[#allocation36_spill]] }
 0x1ba   : > { %v3728_v16 = vsub.f32 %v3716_v8, %v860_v15  ;;  %v935_v15 = vsub.s32 1, %v3760_v11 }
 0x1bc   : > { %v864_v17 = vmul.f32 %v3728_v16, %v3728_v16 }
 0x1be   : > { %866 = vadd.xlane.f32.xlu1 %v864_v17  ;;  %v940_v17 = vrot.slane %v927_v14, %v939_v13 }
 0x218   : > { %v840_v20 = vpop.f32.mrb[0].mxu0 }
 0x219   : > { %v841_v21 = vadd.f32 %v2409_v18, %v840_v20  ;;  %v2595_v22 = vpop.f32.mrb[1].mxu0  ;;  %v936_v20 = vrot.slane %v927_v14, %v935_v15 }
 0x21a   : > { %v843_v23 = vpop.f32.mrb[2].mxu0 }
 0x21b   : > { %v3735_v24 = vadd.f32 %v841_v21, %v734_v19  ;;  %v2596_v25 = vpop.f32.mrb[3].mxu0 }
 0x21d   : > { %857 = vadd.xlane.f32.xlu0 %v3735_v24 }
 0x24b   : > { %v867_v55 = vpop.xlane.xlu1 %866 }
 0x24c   : > { %v870_v56 = vmul.f32 0.0078125, %v867_v55 }
 0x24e   : > { %v872_v57 = vadd.f32 1e-05, %v870_v56 }
 0x250   : > { %2898 = vrsqrt.f32 %v872_v57 }
 0x25a   : > { %v2899_v61 = vpop.eup %2898 }
 0x25b   : > { %v876_v62 = vmul.f32 %v2899_v61, %v3728_v16  ;;  %v932_v16 = vrot.slane %v927_v14, %v931_v12 }
 0x25d   : > { %v884_v3 = vmul.f32 %v2418_v63, %v876_v62 }
 0x25f   : > { %v892_v6 = vadd.f32 %v2419_v4, %v884_v3 }
 0x2aa   : > { %v858_v33 = vpop.xlane.xlu0 %857 }
 0x2ab   : > { %v861_v34 = vmul.f32 0.0078125, %v858_v33 }
 0x2ad   : > { %v863_v35 = vsub.f32 %v3735_v24, %v861_v34 }
 0x2af   : > { %v865_v36 = vmul.f32 %v863_v35, %v863_v35 }
 0x2b1   : > { %868 = vadd.xlane.f32.xlu1 %v865_v36 }
 0x33e   : > { %v869_v58 = vpop.xlane.xlu1 %868 }
 0x33f   : > { %v871_v59 = vmul.f32 0.0078125, %v869_v58 }
 0x341   : > { %v873_v60 = vadd.f32 1e-05, %v871_v59 }
 0x343   : > { %2900 = vrsqrt.f32 %v873_v60 }
 0x34d   : > { %v2901_v1 = vpop.eup %2900 }
 0x34e   : > { %v877_v2 = vmul.f32 %v2901_v1, %v863_v35 }
 0x350   : > { %v885_v5 = vmul.f32 %v2418_v63, %v877_v2 }
 0x352   : > { %v893_v7 = vadd.f32 %v2419_v4, %v885_v5 }
 0x354   : > { %v894_v9 = vpack.c.bf16 %v893_v7, %v892_v6 }
 0x356   : > { %1105 = vmatmul.mubr.bf16.vlgmr.msra.gmra.mrb[0].mxu1 %v894_v9  ;;  %2614 = vmatmul.mubr.bf16.vlgmr.msra.gmra.mrb[4].mxu0 %v894_v9 }
 0x357   : > { %2619 = vmatprep.mubr.msk.bf16.mxu1 %vm3277_vm0, %v3276_v0  ;;  %2681 = vmatprep.mubr.msk.bf16.mxu0 %vm3277_vm0, %v3276_v0 }
 0x429   : > { %v1106_v18 = vpop.f32.mrb[0].mxu1  ;;  %v1149_v19 = vpop.f32.mrb[4].mxu0 }
 0x42a   : > { %v1108_v21 = vpop.f32.mrb[1].mxu1  ;;  %v2615_v22 = vpop.f32.mrb[5].mxu0  ;;  %v1107_v26 = vadd.f32 %v1106_v18, %v932_v16  ;;  %v1150_v27 = vadd.f32 %v1149_v19, %v940_v17 }
 0x42b   : > { %v1110_v23 = vpop.f32.mrb[2].mxu1  ;;  %v1152_v25 = vpop.f32.mrb[6].mxu0  ;;  %v1109_v32 = vadd.f32 %v1108_v21, %v936_v20 }
 0x42c   : > { %v1111_v28 = vadd.f32 %v1110_v23, %v932_v16  ;;  %v1153_v29 = vadd.f32 %v1152_v25, %v940_v17  ;;  %v1112_v30 = vpop.f32.mrb[3].mxu1  ;;  %v2616_v31 = vpop.f32.mrb[7].mxu0 }
 0x42d   : > { %v1113_v33 = vadd.f32 %v1112_v30, %v936_v20 }
 0x42e   : > { %v3772_v34 = vpack.c.bf16 %v1111_v28, %v1107_v26  ;;  %v3774_v35 = vpack.c.bf16 %v1153_v29, %v1150_v27 }
 0x42f   : > { %v3776_v36 = vpack.c.bf16 %v1113_v33, %v1109_v32 }
 0x431   : > { %v1170_v37 = vsel %vm1165_vm1, %v3776_v36, 0 }
 0x432   : > { %2618 = vmatpush3.bf16.xpose.msra.mxu1 %v1170_v37 }
 0x433   : > { %2623 = vmatprep.subr.bf16.mxu1 %v3276_v0 }
 0x439   : > { %2620 = vmatmul.mubr.msk.bf16.vlgmr.msra.gmra.mrb[4].mxu1 %vm1165_vm1, %v3772_v34 }
 0x43a   : > { %2624 = vmatpush3.bf16.msra.mxu1 %v3774_v35  ;;  %2625 = vmatprep.mubr.msk.bf16.mxu1 %vm3277_vm0, %v3276_v0 }
 0x43b   : > { %2629 = vmatprep.subr.bf16.mxu1 %v3276_v0 }
 0x50c   : > { %v1206_v39 = vpop.f32.mrb[4].mxu1 }
 0x50d   : > { %v1207_v40 = vadd.f32 %v3792_v38, %v1206_v39  ;;  %v2621_v41 = vpop.f32.mrb[5].mxu1 }
 0x50e   : > { %v1209_v42 = vpop.f32.mrb[6].mxu1 }
 0x50f   : > { %v1210_v43 = vadd.f32 %v3792_v38, %v1209_v42  ;;  %v2622_v44 = vpop.f32.mrb[7].mxu1  ;;  %v1214_v45 = vsel %vm1213_vm2, %v1207_v40, -inf }
 0x510   : > { %1215 = vmax.xlane.f32.xlu0 %v1214_v45 }
 0x511   : > { %v1217_v46 = vsel %vm1213_vm2, %v1210_v43, -inf }
 0x512   : > { %1218 = vmax.xlane.f32.xlu1 %v1217_v46 }
 0x523   : > { %1285 = vrot.lane.b32.xlu1 %v3772_v34, %s3279_s26 }
 0x526   : > { %1288 = vrot.lane.b32.xlu0 %v3776_v36, %s3279_s26 }
 0x59d   : > { %v1216_v47 = vpop.xlane.xlu0 %1215 }
 0x59e   : > { %v1220_v48 = vsub.f32 %v1207_v40, %v1216_v47 }
 0x59f   : > { %v1219_v50 = vpop.xlane.xlu1 %1218 }
 0x5a0   : > { %v1222_v51 = vmul.f32 1.442695, %v1220_v48  ;;  %v1221_v52 = vsub.f32 %v1210_v43, %v1219_v50 }
 0x5a1   : > { %v1289_v56 = vpop.permute.xlu0 %1288 }
 0x5a2   : > { %v1224_v53 = vmul.f32 1.442695, %v1221_v52  ;;  %2902 = vpow2.f32 %v1222_v51  ;;  %v1294_v58 = vsel %vm1165_vm1, %v1289_v56, 0 }
 0x5a3   : > { %v1286_v59 = vpop.permute.xlu1 %1285 }
 0x5a4   : > { %2904 = vpow2.f32 %v1224_v53 }
 0x5ac   : > { %v3802_v54 = vpop.eup %2902 }
 0x5ae   : > { %v3804_v55 = vpop.eup %2904 }
 0x5af   : > { %v1234_v57 = vpack.c.bf16 %v3804_v55, %v3802_v54 }
 0x5b1   : > { %2626 = vmatmul.mubr.msk.bf16.vlgmr.msra.gmra.mrb[8].mxu1 %vm1213_vm2, %v1234_v57 }
 0x5b2   : > { %2630 = vmatpush3.bf16.xpose.msra.mxu1 %v1294_v58  ;;  %2631 = vmatprep.mubr.msk.bf16.mxu1 %vm3277_vm0, %v3276_v0 }
 0x5b3   : > { %2635 = vmatprep.subr.bf16.mxu1 %v3276_v0 }
 0x5b9   : > { %2632 = vmatmul.mubr.msk.bf16.vlgmr.msra.gmra.mrb[12].mxu1 %vm1165_vm1, %v1286_v59 }
 0x5ba   : > { %2637 = vmatprep.mubr.msk.bf16.mxu1 %vm3277_vm0, %v3276_v0 }
 0x684   : > { %v3816_v60 = vpop.f32.mrb[8].mxu1 }
 0x685   : > { %v2627_v61 = vpop.f32.mrb[9].mxu1 }
 0x686   : > { %v3818_v62 = vpop.f32.mrb[10].mxu1 }
 0x687   : > { %v2628_v63 = vpop.f32.mrb[11].mxu1 }
 0x68c   : > { %v1330_v1 = vpop.f32.mrb[12].mxu1 }
 0x68d   : > { %v1331_v2 = vadd.f32 %v3792_v38, %v1330_v1  ;;  %v2633_v3 = vpop.f32.mrb[13].mxu1 }
 0x68e   : > { %v1333_v4 = vpop.f32.mrb[14].mxu1 }
 0x68f   : > { %v1334_v5 = vadd.f32 %v3792_v38, %v1333_v4  ;;  %v2634_v6 = vpop.f32.mrb[15].mxu1  ;;  %v1337_v7 = vsel %vm1213_vm2, %v1331_v2, -inf }
 0x690   : > { %1338 = vmax.xlane.f32.xlu1 %v1337_v7 }
 0x691   : > { %v1340_v9 = vsel %vm1213_vm2, %v1334_v5, -inf }
 0x692   : > { %1341 = vmax.xlane.f32.xlu0 %v1340_v9 }
 0x6a1   : > { %1413 = vrot.lane.b32.xlu1 %v3776_v36, %s3280_s22 }
 0x6a5   : > { %1411 = vrot.lane.b32.xlu1 %v3772_v34, %s3280_s22 }
 0x6a8   : > { %1359 = vrot.lane.b32.xlu0 %v3774_v35, %s3279_s26 }
 0x71d   : > { %v1339_v10 = vpop.xlane.xlu1 %1338 }
 0x71e   : > { %v1343_v13 = vsub.f32 %v1331_v2, %v1339_v10 }
 0x71f   : > { %v1342_v14 = vpop.xlane.xlu0 %1341 }
 0x720   : > { %v1345_v16 = vmul.f32 1.442695, %v1343_v13  ;;  %v1344_v17 = vsub.f32 %v1334_v5, %v1342_v14 }
 0x721   : > { %v1414_v22 = vpop.permute.xlu1 %1413 }
 0x722   : > { %v1347_v18 = vmul.f32 1.442695, %v1344_v17  ;;  %2906 = vpow2.f32 %v1345_v16  ;;  %v1419_v25 = vsel %vm1165_vm1, %v1414_v22, 0 }
 0x723   : > { %v1360_v19 = vpop.permute.xlu0 %1359 }
 0x724   : > { %2908 = vpow2.f32 %v1347_v18  ;;  %2636 = vmatpush3.bf16.msra.mxu1 %v1360_v19 }
 0x725   : > { %2641 = vmatprep.subr.bf16.mxu1 %v3276_v0  ;;  %v1412_v26 = vpop.permute.xlu1 %1411 }
 0x72c   : > { %v3831_v20 = vpop.eup %2906 }
 0x72d   : > { %v1349_v9 = vsel %vm1213_vm2, %v3831_v20, 0.0 }
 0x72e   : > { %v3833_v21 = vpop.eup %2908 }
 0x72f   : > { %v1357_v23 = vpack.c.bf16 %v3833_v21, %v3831_v20  ;;  %v1352_v10 = vsel %vm1213_vm2, %v3833_v21, 0.0 }
 0x731   : > { %2638 = vmatmul.mubr.msk.bf16.vlgmr.msra.gmra.mrb[16].mxu1 %vm1213_vm2, %v1357_v23 }
 0x732   : > { %2642 = vmatpush3.bf16.xpose.msra.mxu1 %v1419_v25  ;;  %2643 = vmatprep.mubr.msk.bf16.mxu1 %vm3277_vm0, %v3276_v0 }
 0x733   : > { %2647 = vmatprep.subr.bf16.mxu1 %v3276_v0 }
 0x739   : > { %2644 = vmatmul.mubr.msk.bf16.vlgmr.msra.gmra.mrb[20].mxu1 %vm1165_vm1, %v1412_v26 }
 0x73a   : > { %2649 = vmatprep.mubr.msk.bf16.mxu1 %vm3277_vm0, %v3276_v0 }
 0x804   : > { %v3845_v27 = vpop.f32.mrb[16].mxu1 }
 0x805   : > { %v2639_v28 = vpop.f32.mrb[17].mxu1 }
 0x806   : > { %v3847_v29 = vpop.f32.mrb[18].mxu1 }
 0x807   : > { %v2640_v30 = vpop.f32.mrb[19].mxu1 }
 0x80c   : > { %v1455_v31 = vpop.f32.mrb[20].mxu1 }
 0x80d   : > { %v1456_v32 = vadd.f32 %v3792_v38, %v1455_v31  ;;  %v2645_v33 = vpop.f32.mrb[21].mxu1 }
 0x80e   : > { %v1458_v37 = vpop.f32.mrb[22].mxu1 }
 0x80f   : > { %v1459_v39 = vadd.f32 %v3792_v38, %v1458_v37  ;;  %v2646_v40 = vpop.f32.mrb[23].mxu1  ;;  %v1462_v41 = vsel %vm1213_vm2, %v1456_v32, -inf }
 0x810   : > { %1463 = vmax.xlane.f32.xlu1 %v1462_v41 }
 0x811   : > { %v1465_v42 = vsel %vm1213_vm2, %v1459_v39, -inf }
 0x812   : > { %1466 = vmax.xlane.f32.xlu0 %v1465_v42  ;;  %v1226_v42 = vsel %vm1213_vm2, %v3802_v54, 0.0  ;;  %v2850_v54 = vld [vmem:[#allocation12] sm:$0xff]  }
 0x813   : > { %2666 = vmatpush3.bf16.msra.mxu0 %v2850_v54  ;;  %v2872_v54 = vld [vmem:[#allocation14 + $0x44] ss:$8 sps:$4 sm:$0xff]  }
 0x814   : > { %2667 = vmatprep.subr.bf16.mxu0 %v3276_v0 }
 0x821   : > { %1537 = vrot.lane.b32.xlu1 %v3776_v36, %s3281_s20 }
 0x825   : > { %1535 = vrot.lane.b32.xlu1 %v3772_v34, %s3281_s20 }
 0x828   : > { %1483 = vrot.lane.b32.xlu0 %v3774_v35, %s3280_s22 }
 0x89d   : > { %v1464_v43 = vpop.xlane.xlu1 %1463 }
 0x89e   : > { %v1468_v44 = vsub.f32 %v1456_v32, %v1464_v43 }
 0x89f   : > { %v1467_v45 = vpop.xlane.xlu0 %1466 }
 0x8a0   : > { %v1470_v46 = vmul.f32 1.442695, %v1468_v44  ;;  %v1469_v47 = vsub.f32 %v1459_v39, %v1467_v45 }
 0x8a1   : > { %v1538_v52 = vpop.permute.xlu1 %1537 }
 0x8a2   : > { %v1472_v48 = vmul.f32 1.442695, %v1469_v47  ;;  %2910 = vpow2.f32 %v1470_v46  ;;  %v1543_v34 = vsel %vm1165_vm1, %v1538_v52, 0  ;;  %v1229_v46 = vsel %vm1213_vm2, %v3804_v55, 0.0  ;;  %v2852_v55 = vld [vmem:[#allocation12 + $0x10] sm:$0xff]   ;;  %v2854_v52 = vld [vmem:[#allocation12 + $0x20] sm:$0xff]  }
 0x8a3   : > { %v1484_v50 = vpop.permute.xlu0 %1483 }
 0x8a4   : > { %2912 = vpow2.f32 %v1472_v48  ;;  %2648 = vmatpush3.bf16.msra.mxu1 %v1484_v50 }
 0x8a5   : > { %2653 = vmatprep.subr.bf16.mxu1 %v3276_v0  ;;  %v1536_v56 = vpop.permute.xlu1 %1535 }
 0x8ac   : > { %v2911_v51 = vpop.eup %2910 }
 0x8ad   : > { %v1474_v13 = vsel %vm1213_vm2, %v2911_v51, 0.0 }
 0x8ae   : > { %v2913_v36 = vpop.eup %2912 }
 0x8af   : > { %v1482_v53 = vpack.c.bf16 %v2913_v36, %v2911_v51 }
 0x8b1   : > { %2650 = vmatmul.mubr.msk.bf16.vlgmr.msra.gmra.mrb[24].mxu1 %vm1213_vm2, %v1482_v53  ;;  %v2855_v53 = vld [vmem:[#allocation12 + $0x28] sm:$0xff]  }
 0x8b2   : > { %2654 = vmatpush3.bf16.xpose.msra.mxu1 %v1543_v34  ;;  %2655 = vmatprep.mubr.msk.bf16.mxu1 %vm3277_vm0, %v3276_v0  ;;  %v2856_v34 = vld [vmem:[#allocation12 + $0x30] sm:$0xff]  }
 0x8b3   : > { %2659 = vmatprep.subr.bf16.mxu1 %v3276_v0 }
 0x8b9   : > { %2656 = vmatmul.mubr.msk.bf16.vlgmr.msra.gmra.mrb[28].mxu1 %vm1165_vm1, %v1536_v56  ;;  %v2857_v56 = vld [vmem:[#allocation12 + $0x38] sm:$0xff]  }
 0x8ba   : > { %2661 = vmatprep.mubr.msk.bf16.mxu1 %vm3277_vm0, %v3276_v0 }
 0x984   : > { %v3868_v57 = vpop.f32.mrb[24].mxu1 }
 0x985   : > { %v2651_v58 = vpop.f32.mrb[25].mxu1 }
 0x986   : > { %v3870_v59 = vpop.f32.mrb[26].mxu1 }
 0x987   : > { %v2652_v61 = vpop.f32.mrb[27].mxu1 }
 0x98c   : > { %v1579_v63 = vpop.f32.mrb[28].mxu1 }
 0x98d   : > { %v1580_v1 = vadd.f32 %v3792_v38, %v1579_v63  ;;  %v2657_v2 = vpop.f32.mrb[29].mxu1 }
 0x98e   : > { %v1582_v3 = vpop.f32.mrb[30].mxu1 }
 0x98f   : > { %v1583_v4 = vadd.f32 %v3792_v38, %v1582_v3  ;;  %v2658_v5 = vpop.f32.mrb[31].mxu1  ;;  %v1586_v6 = vsel %vm1213_vm2, %v1580_v1, -inf  ;;  %v1477_v38 = vsel %vm1213_vm2, %v2913_v36, 0.0 }
 0x990   : > { %1587 = vmax.xlane.f32.xlu0 %v1586_v6 }
 0x991   : > { %v1589_v7 = vsel %vm1213_vm2, %v1583_v4, -inf }
 0x992   : > { %1590 = vmax.xlane.f32.xlu1 %v1589_v7 }
 0x996   : > { %1350 = vadd.xlane.f32.xlu1 %v1349_v9 }
 0x99a   : > { %1353 = vadd.xlane.f32.xlu1 %v1352_v10 }
 0x99e   : > { %1475 = vadd.xlane.f32.xlu1 %v1474_v13 }
 0x9a2   : > { %1478 = vadd.xlane.f32.xlu1 %v1477_v38 }
 0x9a6   : > { %1607 = vrot.lane.b32.xlu0 %v3774_v35, %s3281_s20 }
 0xa1d   : > { %v1588_v14 = vpop.xlane.xlu0 %1587 }
 0xa1e   : > { %v1592_v16 = vsub.f32 %v1580_v1, %v1588_v14 }
 0xa1f   : > { %v1591_v17 = vpop.xlane.xlu1 %1590 }
 0xa20   : > { %v1594_v18 = vmul.f32 1.442695, %v1592_v16  ;;  %v1593_v19 = vsub.f32 %v1583_v4, %v1591_v17 }
 0xa21   : > { %v1608_v20 = vpop.permute.xlu0 %1607 }
 0xa22   : > { %2914 = vpow2.f32 %v1594_v18  ;;  %v1596_v22 = vmul.f32 1.442695, %v1593_v19  ;;  %2660 = vmatpush3.bf16.msra.mxu1 %v1608_v20 }
 0xa23   : > { %v1351_v21 = vpop.xlane.xlu1 %1350 }
 0xa24   : > { %2916 = vpow2.f32 %v1596_v22  ;;  %v1355_v23 = vmax.f32 %v1351_v21, 1e-20 }
 0xa26   : > { %2918 = vrcp.f32 %v1355_v23 }
 0xa27   : > { %v1354_v25 = vpop.xlane.xlu1 %1353 }
 0xa28   : > { %v1356_v26 = vmax.f32 %v1354_v25, 1e-20  ;;  %v2453_v25 = vld [vmem:[%s4072_s19] ss:$0 sm:$0xff] }
 0xa2a   : > { %2920 = vrcp.f32 %v1356_v26 }
 0xa2b   : > { %v1476_v28 = vpop.xlane.xlu1 %1475 }
 0xa2c   : > { %v2915_v30 = vpop.eup %2914  ;;  %v1480_v31 = vmax.f32 %v1476_v28, 1e-20 }
 0xa2d   : > { %v1598_v35 = vsel %vm1213_vm2, %v2915_v30, 0.0 }
 0xa2e   : > { %v2917_v32 = vpop.eup %2916  ;;  %1599 = vadd.xlane.f32.xlu0 %v1598_v35  ;;  %2922 = vrcp.f32 %v1480_v31 }
 0xa2f   : > { %v1479_v33 = vpop.xlane.xlu1 %1478  ;;  %v1601_v37 = vsel %vm1213_vm2, %v2917_v32, 0.0  ;;  %v1606_v39 = vpack.c.bf16 %v2917_v32, %v2915_v30 }
 0xa30   : > { %v1481_v40 = vmax.f32 %v1479_v33, 1e-20  ;;  %1602 = vadd.xlane.f32.xlu1 %v1601_v37  ;;  %v2919_v41 = vpop.eup %2918 }
 0xa31   : > { %2662 = vmatmul.mubr.msk.bf16.vlgmr.msra.gmra.mrb[32].mxu1 %vm1213_vm2, %v1606_v39  ;;  %v1408_v44 = vmul.f32 %v2919_v41, %v3845_v27  ;;  %v2851_v27 = vld [vmem:[#allocation12 + $0x8] sm:$0xff]   ;;  %v2863_v41 = vld [vmem:[#allocation14 + $0x14] ss:$8 sps:$4 sm:$0xff]  }
 0xa32   : > { %2924 = vrcp.f32 %v1481_v40  ;;  %1973 = vmatprep.mubr.bf16.mxu1 %v3278_v49  ;;  %2668 = vmatpush3.bf16.msra.mxu0 %v2851_v27  ;;  %v2858_v39 = vld [vmem:[#allocation14] ss:$8 sps:$4 sm:$0xff]   ;;  %v2860_v40 = vld [vmem:[#allocation14 + $0x4] ss:$8 sps:$4 sm:$0xff]  }
 0xa33   : > { %2669 = vmatprep.subr.bf16.mxu0 %v3276_v0  ;;  %1941 = vmatprep.subr.bf16.mxu1 %v2860_v40  ;;  %v2870_v27 = vld [vmem:[#allocation14 + $0x40] ss:$8 sps:$4 sm:$0xff]  }
 0xa34   : > { %v2921_v43 = vpop.eup %2920  ;;  %1227 = vadd.xlane.f32.xlu1 %v1226_v42  ;;  %1942 = vmatpush1.bf16.msra.mxu1 %v2858_v39  ;;  %v2861_v42 = vld [vmem:[#allocation14 + $0x10] ss:$8 sps:$4 sm:$0xff]  }
 0xa35   : > { %v1409_v45 = vmul.f32 %v2921_v43, %v3847_v29  ;;  %v2853_v29 = vld [vmem:[#allocation12 + $0x18] sm:$0xff]   ;;  %1943 = vmatprep.subr.bf16.mxu1 %v2863_v41 }
 0xa36   : > { %2670 = vmatpush3.bf16.msra.mxu0 %v2852_v55  ;;  %v2875_v55 = vld [vmem:[#allocation14 + $0x54] ss:$8 sps:$4 sm:$0xff]  }
 0xa37   : > { %v1410_v47 = vpack.c.bf16 %v1409_v45, %v1408_v44  ;;  %2671 = vmatprep.subr.bf16.mxu0 %v3276_v0 }
 0xa38   : > { %1230 = vadd.xlane.f32.xlu1 %v1229_v46  ;;  %v2923_v48 = vpop.eup %2922  ;;  %1944 = vmatpush1.bf16.msra.mxu1 %v2861_v42 }
 0xa39   : > { %v1532_v51 = vmul.f32 %v2923_v48, %v3868_v57 }
 0xa3a   : > { %2672 = vmatpush3.bf16.msra.mxu0 %v2853_v29  ;;  %v2873_v29 = vld [vmem:[#allocation14 + $0x50] ss:$8 sps:$4 sm:$0xff]  }
 0xa3b   : > { %2673 = vmatprep.subr.bf16.mxu0 %v3276_v0 }
 0xa3c   : > { %v2925_v50 = vpop.eup %2924 }
 0xa3d   : > { %v1533_v49 = vmul.f32 %v2925_v50, %v3870_v59  ;;  %v2866_v50 = vld [vmem:[#allocation14 + $0x24] ss:$8 sps:$4 sm:$0xff]  }
 0xa3e   : > { %2674 = vmatpush3.bf16.msra.mxu0 %v2854_v52  ;;  %1945 = vmatprep.subr.bf16.mxu1 %v2866_v50  ;;  %v2878_v52 = vld [vmem:[#allocation14 + $0x64] ss:$8 sps:$4 sm:$0xff]  }
 0xa3f   : > { %v1534_v36 = vpack.c.bf16 %v1533_v49, %v1532_v51  ;;  %2675 = vmatprep.subr.bf16.mxu0 %v3276_v0  ;;  %v2864_v51 = vld [vmem:[#allocation14 + $0x20] ss:$8 sps:$4 sm:$0xff]   ;;  %v2869_v49 = vld [vmem:[#allocation14 + $0x34] ss:$8 sps:$4 sm:$0xff]  }
 0xa40   : > { %1946 = vmatpush1.bf16.msra.mxu1 %v2864_v51 }
 0xa41   : > { %1947 = vmatprep.subr.bf16.mxu1 %v2869_v49 }
 0xa42   : > { %2676 = vmatpush3.bf16.msra.mxu0 %v2855_v53  ;;  %v2876_v53 = vld [vmem:[#allocation14 + $0x60] ss:$8 sps:$4 sm:$0xff]  }
 0xa43   : > { %2677 = vmatprep.subr.bf16.mxu0 %v3276_v0 }
 0xa44   : > { %1663 = vrot.lane.b32.xlu0 %v1534_v36, %s3280_s22  ;;  %v2867_v36 = vld [vmem:[#allocation14 + $0x30] ss:$8 sps:$4 sm:$0xff]  }
 0xa45   : > { %1948 = vmatpush1.bf16.msra.mxu1 %v2867_v36 }
 0xa46   : > { %2678 = vmatpush3.bf16.msra.mxu0 %v2856_v34  ;;  %1949 = vmatprep.subr.bf16.mxu1 %v2872_v54  ;;  %v2881_v34 = vld [vmem:[#allocation14 + $0x74] ss:$8 sps:$4 sm:$0xff]  }
 0xa47   : > { %2679 = vmatprep.subr.bf16.mxu0 %v3276_v0 }
 0xa49   : > { %1660 = vrot.lane.b32.xlu1 %v1410_v47, %s3281_s20  ;;  %1950 = vmatpush1.bf16.msra.mxu1 %v2870_v27  ;;  %s2408_s20 = sshll.u32 %s3679_s12, 3 }
 0xa4a   : > { %2680 = vmatpush3.bf16.msra.mxu0 %v2857_v56  ;;  %1951 = vmatprep.subr.bf16.mxu1 %v2875_v55  ;;  %v2879_v56 = vld [vmem:[#allocation14 + $0x70] ss:$8 sps:$4 sm:$0xff]   ;;  %s725_s16 = scalar_lea.vmem [#allocation17], %s2408_s20 }
 0xa4b   : > { %s2224_s19 = sshll.u32 %s725_s16, 4  ;;  %s3947_s19 = int_to_ptr.vmem [resolvable:$true] %s2224_s19 }
 0xa4c   : > { %s3174_s1 = scalar_lea.vmem %s3947_s19, 128 }
 0xa4d   : > { %1952 = vmatpush1.bf16.msra.mxu1 %v2873_v29  ;;  %p3175_p8 = scmp.ne.s32.totalorder %s3947_s19, %s3174_s1 }
 0xa4e   : > { %1953 = vmatprep.subr.bf16.mxu1 %v2878_v52 }
 0xa4f   : > { %p3176_p2 = pnand %p3175_p8, %p4078_p0 }
 0xa51   : > { %1954 = vmatpush1.bf16.msra.mxu1 %v2876_v53  ;;  %p3177_p3 = pneg %p3176_p2 }
 0xa52   : > { %1955 = vmatprep.subr.bf16.mxu1 %v2881_v34 }
 0xa55   : > { %1956 = vmatpush1.bf16.msra.mxu1 %v2879_v56 }
 0xabb   : > { %v1600_v6 = vpop.xlane.xlu0 %1599 }
 0xabc   : > { %v1604_v7 = vmax.f32 %v1600_v6, 1e-20 }
 0xabd   : > { %v1603_v57 = vpop.xlane.xlu1 %1602 }
 0xabe   : > { %v1605_v9 = vmax.f32 %v1603_v57, 1e-20 }
 0xabf   : > { %v1664_v20 = vpop.permute.xlu0 %1663 }
 0xac1   : > { %v1228_v58 = vpop.xlane.xlu1 %1227 }
 0xac2   : > { %v1232_v59 = vmax.f32 %v1228_v58, 1e-20 }
 0xac4   : > { %2926 = vrcp.f32 %v1232_v59 }
 0xac5   : > { %v1231_v61 = vpop.xlane.xlu1 %1230 }
 0xac6   : > { %v1233_v63 = vmax.f32 %v1231_v61, 1e-20 }
 0xac8   : > { %2928 = vrcp.f32 %v1233_v63 }
 0xac9   : > { %2930 = vrcp.f32 %v1604_v7 }
 0xaca   : > { %2932 = vrcp.f32 %v1605_v9  ;;  %v2463_v9 = vld [vmem:[%s4074_s25] ss:$0 sm:$0xff]  ;;  %s3282_s25 = smov [#allocation17]  }
 0xacb   : > { %s3178_s18 = sshll.u32 %s3282_s25, 4  ;;  %s3179_s18 = int_to_ptr.vmem [resolvable:$false] %s3178_s18 }
 0xacc   : > { %s3180_s13 = scalar_lea.vmem %s3179_s18, 256  ;;  %p3181_p7 = scmp.lt.s32.totalorder %s3947_s19, %s3179_s18 }
 0xacd   : > { %p3182_p5 = scmp.lt.s32.totalorder %s3180_s13, %s3174_s1 }
 0xace   : > { %v2927_v1 = vpop.eup %2926 }
 0xacf   : > { %v1281_v3 = vmul.f32 %v2927_v1, %v3816_v60  ;;  %v1661_v60 = vpop.permute.xlu1 %1660  ;;  %p3183_p9 = por %p3182_p5, %p3181_p7 }
 0xad1   : > { %p3184_p4 = pnand %p3183_p9, %p3177_p3 }
 0xad2   : > { %v2929_v2 = vpop.eup %2928 }
 0xad3   : > { %v1282_v4 = vmul.f32 %v2929_v2, %v3818_v62  ;;  %v2931_v10 = vpop.eup %2930 }
 0xad4   : > { %v2933_v38 = vpop.eup %2932 }
 0xad5   : > { %v1283_v5 = vpack.c.bf16 %v1282_v4, %v1281_v3  ;;  %v2462_v4 = vld [vmem:[%s4073_s0] ss:$0 sm:$0xff]  ;;  %s4077_s0 = sld [smem:[#allocation41_spill]] }
 0xad7   : > { %v1670_v62 = vsel %vm1165_vm1, %v1283_v5, %v1661_v60  ;;  %v2887_v60 = vld [vmem:[#allocation15 + $0x10] sm:$0xff]  }
 0xad8   : > { %v1673_v22 = vsel %vm1671_vm3, %v1670_v62, %v1664_v20  ;;  %v2888_v62 = vld [vmem:[#allocation15 + $0x58] sm:$0xff]  }
 0xad9   : > { %v2889_v20 = vld [vmem:[#allocation15 + $0x18] sm:$0xff]  }
 0xadb   : > { %s3945_s23 = scalar_lea.hbm %s4077_s0, %s2506_s17 }
 0xb04   : > { %v1647_v0 = vpop.f32.mrb[32].mxu1 }
 0xb05   : > { %v2663_v13 = vpop.f32.mrb[33].mxu1  ;;  %v1656_v16 = vmul.f32 %v2931_v10, %v1647_v0 }
 0xb06   : > { %v1650_v14 = vpop.f32.mrb[34].mxu1 }
 0xb07   : > { %v1657_v17 = vmul.f32 %v2933_v38, %v1650_v14  ;;  %v2664_v18 = vpop.f32.mrb[35].mxu1  ;;  %v2882_v14 = vld [vmem:[#allocation15 + $0x40] sm:$0xff]  }
 0xb08   : > { %2555 = vmatprep.subr.bf16.mxu0 %v2882_v14  ;;  %v2885_v18 = vld [vmem:[#allocation15 + $0x8] sm:$0xff]  }
 0xb09   : > { %v1658_v19 = vpack.c.bf16 %v1657_v17, %v1656_v16  ;;  %v2883_v16 = vld [vmem:[#allocation15] sm:$0xff]   ;;  %v2884_v17 = vld [vmem:[#allocation15 + $0x48] sm:$0xff]  }
 0xb0b   : > { %1666 = vrot.lane.b32.xlu1 %v1658_v19, %s3279_s26  ;;  %v2886_v19 = vld [vmem:[#allocation15 + $0x50] sm:$0xff]   ;;  %s4076_s26 = sld [smem:[#allocation40_spill]] }
 0xb7d   : > { %v1667_v21 = vpop.permute.xlu1 %1666 }
 0xb7e   : > { %v1676_v23 = vsel %vm1674_vm4, %v1673_v22, %v1667_v21  ;;  %v2890_v22 = vld [vmem:[#allocation15 + $0x60] sm:$0xff]  }
 0xb7f   : > { %2682 = vmatmul.mubr.bf16.vlgmr.msra.gmra.mrb[8].mxu0 %v1676_v23  ;;  %v2891_v21 = vld [vmem:[#allocation15 + $0x20] sm:$0xff]   ;;  %v2892_v23 = vld [vmem:[#allocation15 + $0x68] sm:$0xff]  }
 0xb80   : > { %2556 = vmatpush3.bf16.msra.mxu0 %v2883_v16 }
 0xb81   : > { %2557 = vmatprep.subr.bf16.mxu0 %v2884_v17 }
 0xb84   : > { %2558 = vmatpush3.bf16.msra.mxu0 %v2885_v18 }
 0xb85   : > { %2559 = vmatprep.subr.bf16.mxu0 %v2886_v19  ;;  %v2480_v19 = vld [vmem:[%s4076_s26] ss:$0 sm:$0xff] }
 0xb88   : > { %2560 = vmatpush3.bf16.msra.mxu0 %v2887_v60 }
 0xb89   : > { %2561 = vmatprep.subr.bf16.mxu0 %v2888_v62 }
 0xb8c   : > { %2562 = vmatpush3.bf16.msra.mxu0 %v2889_v20 }
 0xb8d   : > { %2563 = vmatprep.subr.bf16.mxu0 %v2890_v22 }
 0xb90   : > { %2564 = vmatpush3.bf16.msra.mxu0 %v2891_v21 }
 0xb91   : > { %2565 = vmatprep.subr.bf16.mxu0 %v2892_v23 }
 0xc52   : > { %v1783_v26 = vpop.f32.mrb[8].mxu0 }
 0xc53   : > { %v1784_v28 = vadd.f32 %v2453_v25, %v1783_v26  ;;  %v2683_v30 = vpop.f32.mrb[9].mxu0  ;;  %v2894_v26 = vld [vmem:[#allocation15 + $0x70] sm:$0xff]  }
 0xc54   : > { %v1786_v31 = vpop.f32.mrb[10].mxu0  ;;  %v2896_v30 = vld [vmem:[#allocation15 + $0x78] sm:$0xff]  }
 0xc55   : > { %v3913_v35 = vadd.f32 %v1784_v28, %v3716_v8  ;;  %v1787_v32 = vadd.f32 %v2453_v25, %v1786_v31  ;;  %v2684_v33 = vpop.f32.mrb[11].mxu0  ;;  %v2893_v25 = vld [vmem:[#allocation15 + $0x28] sm:$0xff]   ;;  %v2895_v28 = vld [vmem:[#allocation15 + $0x30] sm:$0xff]   ;;  %v2897_v31 = vld [vmem:[#allocation15 + $0x38] sm:$0xff]  }
 0xc56   : > { %2566 = vmatpush3.bf16.msra.mxu0 %v2893_v25 }
 0xc57   : > { %v3916_v37 = vadd.f32 %v1787_v32, %v3735_v24  ;;  %1794 = vadd.xlane.f32.xlu1 %v3913_v35  ;;  %2567 = vmatprep.subr.bf16.mxu0 %v2894_v26  ;;  %v1849_v32 = vld [vmem:[%s4075_s14] sm:$0x3] }
 0xc58   : > { %v1854_v33 = vrot.slane %v1849_v32, %v931_v12  ;;  %v1858_v39 = vrot.slane %v1849_v32, %v935_v15 }
 0xc59   : > { %1796 = vadd.xlane.f32.xlu0 %v3916_v37 }
 0xc5a   : > { %2568 = vmatpush3.bf16.msra.mxu0 %v2895_v28 }
 0xc5b   : > { %2569 = vmatprep.subr.bf16.mxu0 %v2896_v30 }
 0xc5e   : > { %2570 = vmatpush3.bf16.msra.mxu0 %v2897_v31 }
 0xce4   : > { %v1795_v43 = vpop.xlane.xlu1 %1794 }
 0xce5   : > { %v1798_v8 = vmul.f32 0.0078125, %v1795_v43 }
 0xce6   : > { %v1797_v44 = vpop.xlane.xlu0 %1796 }
 0xce7   : > { %v1800_v45 = vsub.f32 %v3913_v35, %v1798_v8  ;;  %v1799_v46 = vmul.f32 0.0078125, %v1797_v44 }
 0xce9   : > { %v1801_v24 = vsub.f32 %v3916_v37, %v1799_v46  ;;  %v1802_v47 = vmul.f32 %v1800_v45, %v1800_v45 }
 0xceb   : > { %1804 = vadd.xlane.f32.xlu1 %v1802_v47  ;;  %v1803_v48 = vmul.f32 %v1801_v24, %v1801_v24 }
 0xcef   : > { %1806 = vadd.xlane.f32.xlu1 %v1803_v48 }
 0xd78   : > { %v1805_v57 = vpop.xlane.xlu1 %1804 }
 0xd79   : > { %v1808_v58 = vmul.f32 0.0078125, %v1805_v57 }
 0xd7b   : > { %v1810_v59 = vadd.f32 1e-05, %v1808_v58 }
 0xd7c   : > { %v1807_v61 = vpop.xlane.xlu1 %1806 }
 0xd7d   : > { %2934 = vrsqrt.f32 %v1810_v59  ;;  %v1809_v63 = vmul.f32 0.0078125, %v1807_v61 }
 0xd7f   : > { %v1811_v1 = vadd.f32 1e-05, %v1809_v63 }
 0xd81   : > { %2936 = vrsqrt.f32 %v1811_v1 }
 0xd87   : > { %v2935_v2 = vpop.eup %2934 }
 0xd88   : > { %v1814_v3 = vmul.f32 %v2935_v2, %v1800_v45 }
 0xd8a   : > { %v1822_v7 = vmul.f32 %v2462_v4, %v1814_v3 }
 0xd8b   : > { %v2937_v5 = vpop.eup %2936 }
 0xd8c   : > { %v1815_v6 = vmul.f32 %v2937_v5, %v1801_v24  ;;  %v1830_v10 = vadd.f32 %v2463_v9, %v1822_v7 }
 0xd8e   : > { %v1823_v0 = vmul.f32 %v2462_v4, %v1815_v6 }
 0xd90   : > { %v1831_v13 = vadd.f32 %v2463_v9, %v1823_v0 }
 0xd92   : > { %v1832_v38 = vpack.c.bf16 %v1831_v13, %v1830_v10 }
 0xd94   : > { %1974 = vmatmul.mubr.bf16.vlgmr.msra.gmra.mrb[36].mxu1 %v1832_v38 }
 0xe67   : > { %v1975_v40 = vpop.f32.mrb[36].mxu1 }
 0xe68   : > { %v1976_v41 = vadd.f32 %v1975_v40, %v1854_v33  ;;  %v1977_v42 = vpop.f32.mrb[37].mxu1 }
 0xe69   : > { %v1978_v43 = vadd.f32 %v1977_v42, %v1858_v39  ;;  %v1979_v8 = vpop.f32.mrb[38].mxu1 }
 0xe6a   : > { %v1984_v44 = vmul.f32 %v1976_v41, %v1976_v41  ;;  %v1980_v45 = vadd.f32 %v1979_v8, %v1854_v33  ;;  %v1981_v46 = vpop.f32.mrb[39].mxu1 }
 0xe6b   : > { %v1985_v24 = vmul.f32 %v1978_v43, %v1978_v43  ;;  %v1982_v47 = vadd.f32 %v1981_v46, %v1858_v39 }
 0xe6c   : > { %v1988_v48 = vmul.f32 %v1984_v44, %v1976_v41  ;;  %v1986_v50 = vmul.f32 %v1980_v45, %v1980_v45 }
 0xe6d   : > { %v1989_v51 = vmul.f32 %v1985_v24, %v1978_v43  ;;  %v1987_v49 = vmul.f32 %v1982_v47, %v1982_v47 }
 0xe6e   : > { %v1992_v36 = vmul.f32 0.044715, %v1988_v48  ;;  %v1990_v54 = vmul.f32 %v1986_v50, %v1980_v45 }
 0xe6f   : > { %v1993_v12 = vmul.f32 0.044715, %v1989_v51  ;;  %v1991_v27 = vmul.f32 %v1987_v49, %v1982_v47 }
 0xe70   : > { %v1996_v11 = vadd.f32 %v1992_v36, %v1976_v41  ;;  %v1994_v15 = vmul.f32 0.044715, %v1990_v54 }
 0xe71   : > { %v1997_v55 = vadd.f32 %v1993_v12, %v1978_v43  ;;  %v1995_v29 = vmul.f32 0.044715, %v1991_v27 }
 0xe72   : > { %v2000_v52 = vmul.f32 0.7978846, %v1996_v11  ;;  %v1998_v53 = vadd.f32 %v1994_v15, %v1980_v45 }
 0xe73   : > { %v2001_v34 = vmul.f32 0.7978846, %v1997_v55  ;;  %v1999_v56 = vadd.f32 %v1995_v29, %v1982_v47 }
 0xe74   : > { %2938 = vtanh.f32 %v2000_v52  ;;  %v2002_v57 = vmul.f32 0.7978846, %v1998_v53 }
 0xe75   : > { %2940 = vtanh.f32 %v2001_v34  ;;  %v2003_v58 = vmul.f32 0.7978846, %v1999_v56 }
 0xe76   : > { %2942 = vtanh.f32 %v2002_v57 }
 0xe77   : > { %2944 = vtanh.f32 %v2003_v58 }
 0xe7e   : > { %v2939_v59 = vpop.eup %2938 }
 0xe7f   : > { %v2941_v61 = vpop.eup %2940  ;;  %v2008_v63 = vadd.f32 1.0, %v2939_v59 }
 0xe80   : > { %v2943_v1 = vpop.eup %2942  ;;  %v2009_v2 = vadd.f32 1.0, %v2941_v61 }
 0xe81   : > { %v2945_v3 = vpop.eup %2944  ;;  %v2012_v4 = vmul.f32 0.5, %v2008_v63  ;;  %v2010_v5 = vadd.f32 1.0, %v2943_v1 }
 0xe82   : > { %v2011_v6 = vadd.f32 1.0, %v2945_v3  ;;  %v2013_v7 = vmul.f32 0.5, %v2009_v2 }
 0xe83   : > { %v2014_v9 = vmul.f32 0.5, %v2010_v5  ;;  %v2016_v10 = vmul.f32 %v2012_v4, %v1976_v41 }
 0xe84   : > { %v2015_v0 = vmul.f32 0.5, %v2011_v6  ;;  %v2017_v38 = vmul.f32 %v2013_v7, %v1978_v43 }
 0xe85   : > { %v2018_v13 = vmul.f32 %v2014_v9, %v1980_v45 }
 0xe86   : > { %v2019_v14 = vmul.f32 %v2015_v0, %v1982_v47 }
 0xe87   : > { %v2020_v16 = vpack.c.bf16 %v2018_v13, %v2016_v10 }
 0xe88   : > { %v2021_v17 = vpack.c.bf16 %v2019_v14, %v2017_v38 }
 0xe8a   : > { %2189 = vmatprep.mubr.bf16.mxu0 %v2021_v17 }
 0xe8b   : > { %2190 = vmatmul.mubr.bf16.vlgmr.msra.gmra.mrb[12].mxu0 %v2020_v16 }
 0xf5e   : > { %v2571_v18 = vpop.f32.mrb[12].mxu0 }
 0xf5f   : > { %v2572_v60 = vpop.f32.mrb[13].mxu0 }
 0xf60   : > { %v2573_v62 = vadd.f32 %v2572_v60, %v2571_v18  ;;  %v2574_v20 = vpop.f32.mrb[14].mxu0 }
 0xf61   : > { %v2575_v22 = vpop.f32.mrb[15].mxu0 }
 0xf62   : > { %v2192_v21 = vadd.f32 %v2573_v62, %v2480_v19  ;;  %v2576_v23 = vadd.f32 %v2575_v22, %v2574_v20 }
 0xf64   : > { %v2195_v25 = vadd.f32 %v2576_v23, %v2480_v19  ;;  %v2198_v26 = vadd.f32 %v2192_v21, %v3913_v35 }
 0xf66   : > { %v2199_v28 = vadd.f32 %v2195_v25, %v3916_v37 }
 0xf68   : > { %v2510_v30 = vpack.c.bf16 %v2199_v28, %v2198_v26 }
 0xf6a   : > { %2511 = vst [vmem:[%s725_s16] sm:$0xff] %v2510_v30  }
 0xf6b   : > { %3187 = shalt.err (!%p3184_p4)
}
 0xf6c   : > { %s3188_s14 = scalar_lea.hbm %s3945_s23, 128  ;;  %s3192_s26 = scalar_lea.hbm %s4077_s0, 512 }
 0xf6d   : > { %p3189_p10 = scmp.ne.s32.totalorder %s3945_s23, %s3188_s14  ;;  %p3193_p12 = scmp.lt.u32.totalorder %s3945_s23, %s4077_s0 }
 0xf6e   : > { %p3194_p13 = scmp.lt.u32.totalorder %s3192_s26, %s3188_s14  ;;  %p3196_p8 = scmp.lt.u32.totalorder %s3188_s14, %s3945_s23 }
 0xf6f   : > { %p3190_p1 = pnand %p3189_p10, %p4078_p0 }
 0xf70   : > { %p3195_p6 = por %p3194_p13, %p3193_p12 }
 0xf71   : > { %p3191_p11 = pneg %p3190_p1 }
 0xf72   : > { %p3197_p2 = por %p3196_p8, %p3195_p6 }
 0xf74   : > { %p3198_p3 = pnand %p3197_p2, %p3191_p11 }
 0xf76   : > { %3201 = shalt.err (!%p3198_p3)
}
 0xf77   : > { %s3283_s16 = smov 4  }
 0xf78   : > { %2713 = dma.vmem_to_hbm [thread:$0]  (%p4078_p0), %s3947_s19, 128, %s3945_s23, %s2211_s10, %s3280_s22, %s3280_s22, %s3283_s16  }
 0xf79 PF: > { %p2758_p7 = scmp.ge.s32.totalorder %s3260_s30, 2  ;;  %s2239_s4 = sand.u32 1, %s3248_s27  }
 0xf7a   : > { %p4079_p5 = scmp.ne.s32.totalorder %s4056_s15, 0  ;;  %s2240_s11 = scalar_lea.sflag [#allocation5], %s2239_s4 }
 0xf7c   : > { %p2742_p9 = pnand %p2758_p7, %p4079_p5 }
 0xf7e   : > { %3243 = dma.done.wait (!%p2742_p9), %s2240_s11, 128  }
 0xf7f   : > { %3245 = vsyncadd (!%p2742_p9), %s2240_s11, 4294967168  ;;  %s4080_s24 = sld [smem:[#allocation25_spill]]  ;;  %p37_p4 = scmp.ge.s32.totalorder %s3572_s21, 6  }
 0xf80   : > { %s4081_s27 = smov %s3252_s28  ;;  %s4082_s28 = smov %s3256_s29 }
 0xf81   : > { %s4084_s30 = smov %s3572_s21  ;;  %39 = sbr.rel (!%p37_p4) target bundleno = 27 (0x1b), region = 177 }
 0xf85   : > { %s4083_s29 = smov %s4080_s24 }
 0xf88   :  { %2245 = vsyncpa [#allocation4], 1 }
 0xf89   :  { %2247 = vsyncpa [#allocation4 + $0x1], 1 }
 0xf8a   :  { %2248 = vsyncpa [#allocation7], 1 }
 0xf8b   :  { %2250 = vsyncpa [#allocation7 + $0x1], 1 }
 0xf8c   :  { %2251 = vsyncpa [#allocation10], 1 }
 0xf8d   :  { %2252 = vsyncpa [#allocation13], 1 }
 0xf8e   :  { %2253 = vsyncpa [#allocation16], 1 }
 0xf8f   :  { %2254 = vsyncpa [#allocation5], 1 }
 0xf90   :  { %2256 = vsyncpa [#allocation5 + $0x1], 1 }

</bundles_post_ra>
